<compile_context>
chip_gen: v7x
topology: tpu7x:2x2x1
jax: 0.10.0
libtpu: 0.0.40
codegen_flags: <defaults>
</compile_context>

<pallas_src>
import math

import numpy as np
import jax
import jax.numpy as jnp
from jax import lax
from jax.experimental import pallas as pl
from jax.experimental.pallas import tpu as pltpu


def _round_up(x, m):
    return (x + m - 1) // m * m


def _vmem_limit_bytes():
    cap = 128 * 1024 * 1024
    try:
        info = pltpu.get_tpu_info()
        cap = int(getattr(info, "vmem_capacity_bytes", cap) or cap)
    except Exception:
        cap = 64 * 1024 * 1024
    return max(32 * 1024 * 1024, min(cap * 3 // 4, 96 * 1024 * 1024))


def _compiler_params():
    return pltpu.CompilerParams(dimension_semantics=("arbitrary",),
                                vmem_limit_bytes=_vmem_limit_bytes())


# ----------------------------- Pallas kernels ------------------------------ #

def _conv3x3_raw(read, w_ref, cin, wp, nc, patches_ref):
    """3x3 conv over the flat padded layout.  `read(off)` returns the
    (cin, nc) bf16 input slab for tap offset `off`; the f32 result at lane l
    is the conv centred at flat position l + wp + 1 of the input layout."""
    if patches_ref is not None:
        # small Cin: merged-K im2col -> one deep MXU matmul (K = 9*cin)
        for t in range(9):
            off = (t // 3) * wp + (t % 3)
            patches_ref[t * cin:(t + 1) * cin, :] = read(off)
        return jnp.dot(w_ref[...], patches_ref[...],
                       preferred_element_type=jnp.float32)
    # large Cin: 9 accumulating dots, no scratch / no extra vector-store traffic
    acc = None
    for t in range(9):
        off = (t // 3) * wp + (t % 3)
        part = jnp.dot(w_ref[:, t * cin:(t + 1) * cin], read(off),
                       preferred_element_type=jnp.float32)
        acc = part if acc is None else acc + part
    return acc


def _make_conv_kernel(cin, cout, wp, nc, lw, use_im2col):
    # conv3x3(no bias) -> folded BN -> LeakyReLU(0.1); output masked to the
    # next conv's zero-padded flat layout and stored bf16, lane-dense.
    def kernel(x_ref, w_ref, scale_ref, shift_ref, mask_ref, o_ref, *scratch):
        patches = scratch[0] if use_im2col else None
        raw = _conv3x3_raw(lambda off: x_ref[:, off:off + nc],
                           w_ref, cin, wp, nc, patches)
        y = raw * scale_ref[...] + shift_ref[...]
        y = jnp.where(y >= 0.0, y, 0.1 * y) * mask_ref[...]
        o_ref[:, :nc] = y.astype(o_ref.dtype)
        o_ref[:, nc:] = jnp.zeros((cout, lw - nc), o_ref.dtype)
    return kernel


def _make_head_pair_kernel(cin, wp, nc, lw, use_im2col):
    # Fused conf+pos FBODetection_heads sharing one input:
    # conv3x3(no bias) -> BN -> LeakyReLU -> block-diagonal conv1x1(+bias).
    def kernel(x_ref, w3_ref, scale_ref, shift_ref, w1_ref, b1_ref, o_ref, *scratch):
        patches = scratch[0] if use_im2col else None
        raw = _conv3x3_raw(lambda off: x_ref[:, off:off + nc],
                           w3_ref, cin, wp, nc, patches)
        y = raw * scale_ref[...] + shift_ref[...]
        y = jnp.where(y >= 0.0, y, 0.1 * y)
        z = jnp.dot(w1_ref[...], y.astype(jnp.bfloat16),
                    preferred_element_type=jnp.float32) + b1_ref[...]
        o_ref[:, :nc] = z
        o_ref[:, nc:] = jnp.zeros((o_ref.shape[0], lw - nc), jnp.float32)
    return kernel


def _make_agg_b1_kernel(cin, cmid, cout, wp, nc, lw):
    # Fused ImagesAggregation stand-in + first backbone conv: the intermediate
    # out0 stays in a VMEM scratch (already in the padded flat layout).
    def kernel(x_ref, wa_ref, sa_ref, ha_ref, ma_ref,
               wb_ref, sb_ref, hb_ref, mb_ref, o_ref, mid_ref, patches_ref):
        rawa = _conv3x3_raw(lambda off: x_ref[:, off:off + nc],
                            wa_ref, cin, wp, nc, patches_ref)
        ya = rawa * sa_ref[...] + ha_ref[...]
        ya = jnp.where(ya >= 0.0, ya, 0.1 * ya) * ma_ref[...]
        mid_ref[:, :nc] = ya.astype(jnp.bfloat16)
        mid_ref[:, nc:] = jnp.zeros((cmid, lw - nc), jnp.bfloat16)
        rawb = _conv3x3_raw(lambda off: mid_ref[:, off:off + nc],
                            wb_ref, cmid, wp, nc, patches_ref)
        yb = rawb * sb_ref[...] + hb_ref[...]
        yb = jnp.where(yb >= 0.0, yb, 0.1 * yb) * mb_ref[...]
        o_ref[:, :nc] = yb.astype(o_ref.dtype)
        o_ref[:, nc:] = jnp.zeros((cout, lw - nc), o_ref.dtype)
    return kernel


# ------------------------- layout helpers (wrapper) ------------------------- #

def _geom(batch, h, w, chain_depth):
    """Geometry of the B-folded padded flat layout for one spatial resolution."""
    hp, wp = h + 2, w + 2
    seg = hp * wp                      # per-batch segment (padded image)
    base0 = chain_depth * (wp + 1)     # each chained conv shifts the base by wp+1
    halo = 2 * wp + 2
    # TODO(synk): real resolutions (wp > 126) need wp padded to a multiple of 128
    # plus pltpu.roll for the dx shifts, and a spatial-strip grid axis (parallel
    # across v7x's 2 TCs) so the working set fits 64 MiB VMEM.
    assert halo <= 128, "toy-resolution layout; see TODO above"
    nc = _round_up(base0 + batch * seg, 128)   # computed/stored lane width
    lw = nc + 128                              # buffer width (room for the halo)
    return dict(B=batch, H=h, W=w, Hp=hp, Wp=wp, S=seg, A0=base0, NC=nc, LW=lw)


def flatten_to_padded_lanes(x_nchw, g):
    """NCHW -> (Cp, LW) bf16 flat layout with base g['A0'] (zero borders)."""
    b, c, _, _ = x_nchw.shape
    cp = _round_up(c, 16)
    xp = jnp.pad(x_nchw, ((0, 0), (0, cp - c), (1, 1), (1, 1))).astype(jnp.bfloat16)
    xp = jnp.transpose(xp, (1, 0, 2, 3)).reshape(cp, b * g["S"])
    return jnp.pad(xp, ((0, 0), (g["A0"], g["LW"] - g["A0"] - b * g["S"])))


def extract_nchw(flat, base, g, channels=None):
    """Flat layout at `base` -> NCHW (only used at the network outputs and at
    the stride-2 resolution changes of the stand-in backbone)."""
    c = flat.shape[0] if channels is None else channels
    b, h, w, hp, wp, seg = g["B"], g["H"], g["W"], g["Hp"], g["Wp"], g["S"]
    v = flat[:c, base:base + b * seg].reshape(c, b, hp, wp)[:, :, 1:h + 1, 1:w + 1]
    return jnp.transpose(v, (1, 0, 2, 3))


def _interior_mask(base, g):
    """(1, NC) f32 mask: 1 at valid output lanes, 0 at padding / junk lanes."""
    m = np.zeros((1, g["NC"]), np.float32)
    for b in range(g["B"]):
        for y in range(g["H"]):
            s = base + b * g["S"] + (y + 1) * g["Wp"] + 1
            m[0, s:s + g["W"]] = 1.0
    return jnp.asarray(m)


# ------------------------------ stage wrappers ------------------------------ #

def conv_bn_lrelu(xflat, layer, g, base_in):
    """conv3x3(no bias)+BN+LeakyReLU(0.1) on the flat layout -> (flat bf16, base)."""
    w, scale, shift = layer["wp"], layer["s2"], layer["h2"]
    cout, cin = w.shape[0], w.shape[1] // 9
    assert xflat.shape[0] == cin
    base_out = base_in - (g["Wp"] + 1)
    assert base_out >= 0
    mask = _interior_mask(base_out, g)
    use_im2col = cin < 128
    scratch = [pltpu.VMEM((9 * cin, g["NC"]), jnp.bfloat16)] if use_im2col else []
    out = pl.pallas_call(
        _make_conv_kernel(cin, cout, g["Wp"], g["NC"], g["LW"], use_im2col),
        out_shape=jax.ShapeDtypeStruct((cout, g["LW"]), jnp.bfloat16),
        grid=(1,),
        in_specs=[
            pl.BlockSpec(xflat.shape, lambda i: (0, 0)),
            pl.BlockSpec(w.shape, lambda i: (0, 0)),
            pl.BlockSpec(scale.shape, lambda i: (0, 0)),
            pl.BlockSpec(shift.shape, lambda i: (0, 0)),
            pl.BlockSpec(mask.shape, lambda i: (0, 0)),
        ],
        out_specs=pl.BlockSpec((cout, g["LW"]), lambda i: (0, 0)),
        scratch_shapes=scratch,
        compiler_params=_compiler_params(),
    )(xflat, w, scale, shift, mask)
    return out, base_out


def detection_head_pair(xflat, head, g, base_in):
    """Fused conf+pos FBODetection_heads; returns (conf, pos) in NCHW (f32)."""
    w3, scale, shift, w1, b1 = head["w3"], head["s2"], head["h2"], head["w1"], head["b1"]
    cin = w3.shape[1] // 9
    co = w1.shape[0]
    assert xflat.shape[0] == cin
    base_out = base_in - (g["Wp"] + 1)
    assert base_out >= 0
    use_im2col = cin < 128
    scratch = [pltpu.VMEM((9 * cin, g["NC"]), jnp.bfloat16)] if use_im2col else []
    out = pl.pallas_call(
        _make_head_pair_kernel(cin, g["Wp"], g["NC"], g["LW"], use_im2col),
        out_shape=jax.ShapeDtypeStruct((co, g["LW"]), jnp.float32),
        grid=(1,),
        in_specs=[
            pl.BlockSpec(xflat.shape, lambda i: (0, 0)),
            pl.BlockSpec(w3.shape, lambda i: (0, 0)),
            pl.BlockSpec(scale.shape, lambda i: (0, 0)),
            pl.BlockSpec(shift.shape, lambda i: (0, 0)),
            pl.BlockSpec(w1.shape, lambda i: (0, 0)),
            pl.BlockSpec(b1.shape, lambda i: (0, 0)),
        ],
        out_specs=pl.BlockSpec((co, g["LW"]), lambda i: (0, 0)),
        scratch_shapes=scratch,
        compiler_params=_compiler_params(),
    )(xflat, w3, scale, shift, w1, b1)
    dets = extract_nchw(out, base_out, g, co)          # (B, 5, H, W) f32
    return dets[:, :1], dets[:, 1:]


def aggregation_plus_first_conv(xflat, agg, b1, g, base_in):
    """Fused ImagesAggregation stand-in (7->16) + first backbone conv (16->32)."""
    wa, sa, ha = agg["wp"], agg["s2"], agg["h2"]
    wb, sb, hb = b1["wp"], b1["s2"], b1["h2"]
    cin, cmid, cout = wa.shape[1] // 9, wa.shape[0], wb.shape[0]
    assert wb.shape[1] // 9 == cmid and cin == cmid    # shared im2col scratch
    assert xflat.shape[0] == cin
    base_mid = base_in - (g["Wp"] + 1)
    base_out = base_mid - (g["Wp"] + 1)
    assert base_out >= 0
    ma = _interior_mask(base_mid, g)
    mb = _interior_mask(base_out, g)
    out = pl.pallas_call(
        _make_agg_b1_kernel(cin, cmid, cout, g["Wp"], g["NC"], g["LW"]),
        out_shape=jax.ShapeDtypeStruct((cout, g["LW"]), jnp.bfloat16),
        grid=(1,),
        in_specs=[
            pl.BlockSpec(xflat.shape, lambda i: (0, 0)),
            pl.BlockSpec(wa.shape, lambda i: (0, 0)),
            pl.BlockSpec(sa.shape, lambda i: (0, 0)),
            pl.BlockSpec(ha.shape, lambda i: (0, 0)),
            pl.BlockSpec(ma.shape, lambda i: (0, 0)),
            pl.BlockSpec(wb.shape, lambda i: (0, 0)),
            pl.BlockSpec(sb.shape, lambda i: (0, 0)),
            pl.BlockSpec(hb.shape, lambda i: (0, 0)),
            pl.BlockSpec(mb.shape, lambda i: (0, 0)),
        ],
        out_specs=pl.BlockSpec((cout, g["LW"]), lambda i: (0, 0)),
        scratch_shapes=[pltpu.VMEM((cmid, g["LW"]), jnp.bfloat16),
                        pltpu.VMEM((9 * cin, g["NC"]), jnp.bfloat16)],
        compiler_params=_compiler_params(),
    )(xflat, wa, sa, ha, ma, wb, sb, hb, mb)
    return out, base_out


# -------------------------- deterministic parameters ------------------------ #

def _prep_w3(w):
    """(Cout,Cin,3,3) f32 -> (Cout, 9*Cin_p) bf16 with taps (dy,dx) row-major."""
    cout, cin = w.shape[0], w.shape[1]
    cin_p = _round_up(cin, 16)
    w = jnp.transpose(w, (0, 2, 3, 1))
    w = jnp.pad(w, ((0, 0), (0, 0), (0, 0), (0, cin_p - cin)))
    return w.reshape(cout, 9 * cin_p).astype(jnp.bfloat16)


def init_conv_bn(key, cin, cout):
    """conv2d(cin,cout,3,bias=False) + BatchNorm2d(cout) folded into scale/shift."""
    k1, k2, k3, k4, k5 = jax.random.split(key, 5)
    w = jax.random.normal(k1, (cout, cin, 3, 3), jnp.float32) / math.sqrt(cin * 9)
    gamma = 1.0 + 0.1 * jax.random.normal(k2, (cout,), jnp.float32)
    beta = 0.1 * jax.random.normal(k3, (cout,), jnp.float32)
    mean = 0.1 * jax.random.normal(k4, (cout,), jnp.float32)
    var = jnp.abs(jax.random.normal(k5, (cout,), jnp.float32)) + 1.0
    scale = gamma / jnp.sqrt(var + 1e-5)
    shift = beta - mean * scale
    return {"w": w, "scale": scale, "shift": shift,
            "wp": _prep_w3(w), "s2": scale.reshape(-1, 1), "h2": shift.reshape(-1, 1)}


def init_head_pair(key, cin, cmid, n_conf=1, n_pos=4):
    """Two FBODetection_heads ([cmid,1] and [cmid,4], in=cin) packed for the fused
    kernel: 3x3 weights concatenated along Cout, 1x1 weights block-diagonal."""
    kc, kp = jax.random.split(key)

    def one(k, co):
        k1, k2, k3 = jax.random.split(k, 3)
        layer = init_conv_bn(k1, cin, cmid)
        layer["w1"] = jax.random.normal(k2, (co, cmid), jnp.float32) / math.sqrt(cmid)
        layer["b1"] = 0.1 * jax.random.normal(k3, (co,), jnp.float32)
        return layer

    conf, pos = one(kc, n_conf), one(kp, n_pos)
    co = n_conf + n_pos
    w1 = jnp.zeros((co, 2 * cmid), jnp.float32)
    w1 = w1.at[:n_conf, :cmid].set(conf["w1"]).at[n_conf:, cmid:].set(pos["w1"])
    return {"conf": conf, "pos": pos,
            "w3": jnp.concatenate([conf["wp"], pos["wp"]], axis=0),
            "s2": jnp.concatenate([conf["s2"], pos["s2"]], axis=0),
            "h2": jnp.concatenate([conf["h2"], pos["h2"]], axis=0),
            "w1": w1.astype(jnp.bfloat16),
            "b1": jnp.concatenate([conf["b1"], pos["b1"]], axis=0).reshape(-1, 1)}


# ---------------------------------- forward --------------------------------- #

def fbod_inference_multiscale_forward(x_nchw, params):
    B, _, H, W = x_nchw.shape
    g1 = _geom(B, H, W, chain_depth=3)            # agg -> b1 -> {head3 | b2}
    g2 = _geom(B, H // 2, W // 2, chain_depth=1)
    g3 = _geom(B, H // 4, W // 4, chain_depth=1)

    xf = flatten_to_padded_lanes(x_nchw, g1)

    # TODO(synk): ImagesAggregation("multiinput", GRG) and the cspdarknet53
    # FeatureExtraction_MultiOutput sources were not provided; the aggregation
    # and backbone stages below are deterministic conv3x3+BN+LeakyReLU stand-ins
    # with the channel counts implied by the heads (16 / 32 / 128 / 512).
    p1_flat, p1_base = aggregation_plus_first_conv(
        xf, params["agg"], params["b1"], g1, g1["A0"])

    conf3, pos3 = detection_head_pair(p1_flat, params["head3"], g1, p1_base)

    # TODO(synk): stride-2 of the stand-in backbone stages is applied as an XLA
    # slice + re-flatten between resolutions; fold it into the conv kernel (even
    # row/col tap windows) once the real backbone is plugged in.
    p3_full, p3_base = conv_bn_lrelu(p1_flat, params["b2"], g1, p1_base)
    P3 = extract_nchw(p3_full, p3_base, g1)[:, :, ::2, ::2]
    p3_flat = flatten_to_padded_lanes(P3, g2)
    conf2, pos2 = detection_head_pair(p3_flat, params["head2"], g2, g2["A0"])

    p5_full, p5_base = conv_bn_lrelu(p3_flat, params["b3"], g2, g2["A0"])
    P5 = extract_nchw(p5_full, p5_base, g2)[:, :, ::2, ::2]
    p5_flat = flatten_to_padded_lanes(P5, g3)
    conf1, pos1 = detection_head_pair(p5_flat, params["head1"], g3, g3["A0"])

    return ([conf1, pos1], [conf2, pos2], [conf3, pos3])


# --------------------------- pure-JAX reference ----------------------------- #

def _ref_conv_bn_lrelu(x, layer):
    y = lax.conv_general_dilated(
        x.astype(jnp.bfloat16), layer["w"].astype(jnp.bfloat16),
        window_strides=(1, 1), padding=((1, 1), (1, 1)),
        dimension_numbers=("NCHW", "OIHW", "NCHW"),
        preferred_element_type=jnp.float32)
    y = y * layer["scale"][None, :, None, None] + layer["shift"][None, :, None, None]
    return jnp.where(y >= 0.0, y, 0.1 * y)


def _ref_head(x, hp):
    y = _ref_conv_bn_lrelu(x, hp)
    z = jnp.einsum("oc,bchw->bohw", hp["w1"].astype(jnp.bfloat16),
                   y.astype(jnp.bfloat16), preferred_element_type=jnp.float32)
    return z + hp["b1"][None, :, None, None]


def _ref_forward(x, params):
    out0 = _ref_conv_bn_lrelu(x, params["agg"])
    p1 = _ref_conv_bn_lrelu(out0, params["b1"])
    p3 = _ref_conv_bn_lrelu(p1, params["b2"])[:, :, ::2, ::2]
    p5 = _ref_conv_bn_lrelu(p3, params["b3"])[:, :, ::2, ::2]
    return ([_ref_head(p5, params["head1"]["conf"]), _ref_head(p5, params["head1"]["pos"])],
            [_ref_head(p3, params["head2"]["conf"]), _ref_head(p3, params["head2"]["pos"])],
            [_ref_head(p1, params["head3"]["conf"]), _ref_head(p1, params["head3"]["pos"])])


if __name__ == "__main__":
    key = jax.random.PRNGKey(0)
    ks = jax.random.split(key, 8)

    B, H, W = 2, 16, 16
    in_ch = 3 + (5 - 1) * 1      # GRG mode, 5 frames: middle RGB + 4 gray channels

    x_nchw = jax.random.normal(ks[0], (B, in_ch, H, W), jnp.float32)

    params = {
        "agg": init_conv_bn(ks[1], in_ch, 16),
        "b1": init_conv_bn(ks[2], 16, 32),
        "b2": init_conv_bn(ks[3], 32, 128),
        "b3": init_conv_bn(ks[4], 128, 512),
        "head1": init_head_pair(ks[5], 512, 512),   # conf1 / pos1 on P5
        "head2": init_head_pair(ks[6], 128, 128),   # conf2 / pos2 on P3
        "head3": init_head_pair(ks[7], 32, 32),     # conf3 / pos3 on P1
    }

    out = fbod_inference_multiscale_forward(x_nchw, params)
    out = jax.block_until_ready(out)

    (c1, p1), (c2, p2), (c3, p3) = out
    assert c1.shape == (B, 1, H // 4, W // 4) and p1.shape == (B, 4, H // 4, W // 4)
    assert c2.shape == (B, 1, H // 2, W // 2) and p2.shape == (B, 4, H // 2, W // 2)
    assert c3.shape == (B, 1, H, W) and p3.shape == (B, 4, H, W)

    ref = _ref_forward(x_nchw, params)
    for got, want in zip(jax.tree_util.tree_leaves(out), jax.tree_util.tree_leaves(ref)):
        np.testing.assert_allclose(np.asarray(got, np.float32),
                                   np.asarray(want, np.float32),
                                   rtol=3e-2, atol=3e-2)

    print("KERNEL_OK")
</pallas_src>

<mosaic_0001>
module attributes {stable_mosaic.version = 11 : i64} {
  func.func @kernel(%arg0: i32, %arg1: memref<16x896xbf16, #tpu.memory_space<vmem>>, %arg2: memref<16x144xbf16, #tpu.memory_space<vmem>>, %arg3: memref<16x1xf32, #tpu.memory_space<vmem>>, %arg4: memref<16x1xf32, #tpu.memory_space<vmem>>, %arg5: memref<1x768xf32, #tpu.memory_space<vmem>>, %arg6: memref<32x144xbf16, #tpu.memory_space<vmem>>, %arg7: memref<32x1xf32, #tpu.memory_space<vmem>>, %arg8: memref<32x1xf32, #tpu.memory_space<vmem>>, %arg9: memref<1x768xf32, #tpu.memory_space<vmem>>, %arg10: memref<32x896xbf16, #tpu.memory_space<vmem>>, %arg11: memref<16x896xbf16, #tpu.memory_space<vmem>>, %arg12: memref<144x768xbf16, #tpu.memory_space<vmem>>) attributes {dimension_semantics = [#tpu.dimension_semantics<arbitrary>], iteration_bounds = array<i64: 1>, scalar_prefetch = 0 : i64, scratch_operands = 2 : i64, tpu.core_type = #tpu.core_type<tc>, window_params = [{pipeline_mode = #tpu.pipeline_mode<synchronous>, transform_indices = @transform_0, window_bounds = array<i64: 16, 896>}, {pipeline_mode = #tpu.pipeline_mode<synchronous>, transform_indices = @transform_1, window_bounds = array<i64: 16, 144>}, {pipeline_mode = #tpu.pipeline_mode<synchronous>, transform_indices = @transform_2, window_bounds = array<i64: 16, 1>}, {pipeline_mode = #tpu.pipeline_mode<synchronous>, transform_indices = @transform_3, window_bounds = array<i64: 16, 1>}, {pipeline_mode = #tpu.pipeline_mode<synchronous>, transform_indices = @transform_4, window_bounds = array<i64: 1, 768>}, {pipeline_mode = #tpu.pipeline_mode<synchronous>, transform_indices = @transform_5, window_bounds = array<i64: 32, 144>}, {pipeline_mode = #tpu.pipeline_mode<synchronous>, transform_indices = @transform_6, window_bounds = array<i64: 32, 1>}, {pipeline_mode = #tpu.pipeline_mode<synchronous>, transform_indices = @transform_7, window_bounds = array<i64: 32, 1>}, {pipeline_mode = #tpu.pipeline_mode<synchronous>, transform_indices = @transform_8, window_bounds = array<i64: 1, 768>}, {pipeline_mode = #tpu.pipeline_mode<synchronous>, transform_indices = @transform_9, window_bounds = array<i64: 32, 896>}]} {
    %c0 = arith.constant 0 : index
    %c0_0 = arith.constant 0 : index
    %0 = vector.load %arg1[%c0, %c0_0] : memref<16x896xbf16, #tpu.memory_space<vmem>>, vector<16x768xbf16>
    %c0_1 = arith.constant 0 : index
    %c0_2 = arith.constant 0 : index
    %1 = vector.load %arg12[%c0_1, %c0_2] : memref<144x768xbf16, #tpu.memory_space<vmem>>, vector<16x768xbf16>
    tpu.vector_store %arg12[%c0_1, %c0_2], %0 {strides = array<i32>} : memref<144x768xbf16, #tpu.memory_space<vmem>>, vector<16x768xbf16>,
    %c0_3 = arith.constant 0 : index
    %c1 = arith.constant 1 : index
    %2 = vector.load %arg1[%c0_3, %c1] : memref<16x896xbf16, #tpu.memory_space<vmem>>, vector<16x768xbf16>
    %c16 = arith.constant 16 : index
    %c0_4 = arith.constant 0 : index
    %3 = vector.load %arg12[%c16, %c0_4] : memref<144x768xbf16, #tpu.memory_space<vmem>>, vector<16x768xbf16>
    tpu.vector_store %arg12[%c16, %c0_4], %2 {strides = array<i32>} : memref<144x768xbf16, #tpu.memory_space<vmem>>, vector<16x768xbf16>,
    %c0_5 = arith.constant 0 : index
    %c2 = arith.constant 2 : index
    %4 = vector.load %arg1[%c0_5, %c2] : memref<16x896xbf16, #tpu.memory_space<vmem>>, vector<16x768xbf16>
    %c32 = arith.constant 32 : index
    %c0_6 = arith.constant 0 : index
    %5 = vector.load %arg12[%c32, %c0_6] : memref<144x768xbf16, #tpu.memory_space<vmem>>, vector<16x768xbf16>
    tpu.vector_store %arg12[%c32, %c0_6], %4 {strides = array<i32>} : memref<144x768xbf16, #tpu.memory_space<vmem>>, vector<16x768xbf16>,
    %c0_7 = arith.constant 0 : index
    %c18 = arith.constant 18 : index
    %6 = vector.load %arg1[%c0_7, %c18] : memref<16x896xbf16, #tpu.memory_space<vmem>>, vector<16x768xbf16>
    %c48 = arith.constant 48 : index
    %c0_8 = arith.constant 0 : index
    %7 = vector.load %arg12[%c48, %c0_8] : memref<144x768xbf16, #tpu.memory_space<vmem>>, vector<16x768xbf16>
    tpu.vector_store %arg12[%c48, %c0_8], %6 {strides = array<i32>} : memref<144x768xbf16, #tpu.memory_space<vmem>>, vector<16x768xbf16>,
    %c0_9 = arith.constant 0 : index
    %c19 = arith.constant 19 : index
    %8 = vector.load %arg1[%c0_9, %c19] : memref<16x896xbf16, #tpu.memory_space<vmem>>, vector<16x768xbf16>
    %c64 = arith.constant 64 : index
    %c0_10 = arith.constant 0 : index
    %9 = vector.load %arg12[%c64, %c0_10] : memref<144x768xbf16, #tpu.memory_space<vmem>>, vector<16x768xbf16>
    tpu.vector_store %arg12[%c64, %c0_10], %8 {strides = array<i32>} : memref<144x768xbf16, #tpu.memory_space<vmem>>, vector<16x768xbf16>,
    %c0_11 = arith.constant 0 : index
    %c20 = arith.constant 20 : index
    %10 = vector.load %arg1[%c0_11, %c20] : memref<16x896xbf16, #tpu.memory_space<vmem>>, vector<16x768xbf16>
    %c80 = arith.constant 80 : index
    %c0_12 = arith.constant 0 : index
    %11 = vector.load %arg12[%c80, %c0_12] : memref<144x768xbf16, #tpu.memory_space<vmem>>, vector<16x768xbf16>
    tpu.vector_store %arg12[%c80, %c0_12], %10 {strides = array<i32>} : memref<144x768xbf16, #tpu.memory_space<vmem>>, vector<16x768xbf16>,
    %c0_13 = arith.constant 0 : index
    %c36 = arith.constant 36 : index
    %12 = vector.load %arg1[%c0_13, %c36] : memref<16x896xbf16, #tpu.memory_space<vmem>>, vector<16x768xbf16>
    %c96 = arith.constant 96 : index
    %c0_14 = arith.constant 0 : index
    %13 = vector.load %arg12[%c96, %c0_14] : memref<144x768xbf16, #tpu.memory_space<vmem>>, vector<16x768xbf16>
    tpu.vector_store %arg12[%c96, %c0_14], %12 {strides = array<i32>} : memref<144x768xbf16, #tpu.memory_space<vmem>>, vector<16x768xbf16>,
    %c0_15 = arith.constant 0 : index
    %c37 = arith.constant 37 : index
    %14 = vector.load %arg1[%c0_15, %c37] : memref<16x896xbf16, #tpu.memory_space<vmem>>, vector<16x768xbf16>
    %c112 = arith.constant 112 : index
    %c0_16 = arith.constant 0 : index
    %15 = vector.load %arg12[%c112, %c0_16] : memref<144x768xbf16, #tpu.memory_space<vmem>>, vector<16x768xbf16>
    tpu.vector_store %arg12[%c112, %c0_16], %14 {strides = array<i32>} : memref<144x768xbf16, #tpu.memory_space<vmem>>, vector<16x768xbf16>,
    %c0_17 = arith.constant 0 : index
    %c38 = arith.constant 38 : index
    %16 = vector.load %arg1[%c0_17, %c38] : memref<16x896xbf16, #tpu.memory_space<vmem>>, vector<16x768xbf16>
    %c128 = arith.constant 128 : index
    %c0_18 = arith.constant 0 : index
    %17 = vector.load %arg12[%c128, %c0_18] : memref<144x768xbf16, #tpu.memory_space<vmem>>, vector<16x768xbf16>
    tpu.vector_store %arg12[%c128, %c0_18], %16 {strides = array<i32>} : memref<144x768xbf16, #tpu.memory_space<vmem>>, vector<16x768xbf16>,
    %c0_19 = arith.constant 0 : index
    %c0_20 = arith.constant 0 : index
    %18 = vector.load %arg2[%c0_19, %c0_20] : memref<16x144xbf16, #tpu.memory_space<vmem>>, vector<16x144xbf16>
    %c0_21 = arith.constant 0 : index
    %c0_22 = arith.constant 0 : index
    %19 = vector.load %arg12[%c0_21, %c0_22] : memref<144x768xbf16, #tpu.memory_space<vmem>>, vector<144x768xbf16>
    %cst = arith.constant dense<0.000000e+00> : vector<16x768xf32>
    %20 = tpu.matmul %18, %19, %cst {dimension_numbers = #tpu.dot_dimension_numbers<[1], [0], [0], [1], [0, 0, 1, 1], [], []>} : vector<16x144xbf16>, vector<144x768xbf16>, vector<16x768xf32> -> vector<16x768xf32>
    %c0_23 = arith.constant 0 : index
    %c0_24 = arith.constant 0 : index
    %21 = vector.load %arg3[%c0_23, %c0_24] : memref<16x1xf32, #tpu.memory_space<vmem>>, vector<16x1xf32>
    %22 = vector.broadcast %21 : vector<16x1xf32> to vector<16x768xf32>
    %23 = arith.mulf %20, %22 : vector<16x768xf32>
    %c0_25 = arith.constant 0 : index
    %c0_26 = arith.constant 0 : index
    %24 = vector.load %arg4[%c0_25, %c0_26] : memref<16x1xf32, #tpu.memory_space<vmem>>, vector<16x1xf32>
    %25 = vector.broadcast %24 : vector<16x1xf32> to vector<16x768xf32>
    %26 = arith.addf %23, %25 : vector<16x768xf32>
    %cst_27 = arith.constant 0.000000e+00 : f32
    %27 = vector.broadcast %cst_27 : f32 to vector<16x768xf32>
    %28 = arith.cmpf oge, %26, %27 : vector<16x768xf32>
    %cst_28 = arith.constant 1.000000e-01 : f32
    %29 = vector.broadcast %cst_28 : f32 to vector<16x768xf32>
    %30 = arith.mulf %29, %26 : vector<16x768xf32>
    %31 = arith.select %28, %26, %30 : vector<16x768xi1>, vector<16x768xf32>
    %c0_29 = arith.constant 0 : index
    %c0_30 = arith.constant 0 : index
    %32 = vector.load %arg5[%c0_29, %c0_30] : memref<1x768xf32, #tpu.memory_space<vmem>>, vector<1x768xf32>
    %33 = vector.broadcast %32 : vector<1x768xf32> to vector<16x768xf32>
    %34 = arith.mulf %31, %33 : vector<16x768xf32>
    %35 = arith.truncf %34 : vector<16x768xf32> to vector<16x768xbf16>
    %c0_31 = arith.constant 0 : index
    %c0_32 = arith.constant 0 : index
    %36 = vector.load %arg11[%c0_31, %c0_32] : memref<16x896xbf16, #tpu.memory_space<vmem>>, vector<16x768xbf16>
    tpu.vector_store %arg11[%c0_31, %c0_32], %35 {strides = array<i32>} : memref<16x896xbf16, #tpu.memory_space<vmem>>, vector<16x768xbf16>,
    %cst_33 = arith.constant 0.000000e+00 : bf16
    %37 = vector.broadcast %cst_33 : bf16 to vector<16x128xbf16>
    %c0_34 = arith.constant 0 : index
    %c768 = arith.constant 768 : index
    %38 = vector.load %arg11[%c0_34, %c768] : memref<16x896xbf16, #tpu.memory_space<vmem>>, vector<16x128xbf16>
    tpu.vector_store %arg11[%c0_34, %c768], %37 {strides = array<i32>} : memref<16x896xbf16, #tpu.memory_space<vmem>>, vector<16x128xbf16>,
    %c0_35 = arith.constant 0 : index
    %c0_36 = arith.constant 0 : index
    %39 = vector.load %arg11[%c0_35, %c0_36] : memref<16x896xbf16, #tpu.memory_space<vmem>>, vector<16x768xbf16>
    %c0_37 = arith.constant 0 : index
    %c0_38 = arith.constant 0 : index
    %40 = vector.load %arg12[%c0_37, %c0_38] : memref<144x768xbf16, #tpu.memory_space<vmem>>, vector<16x768xbf16>
    tpu.vector_store %arg12[%c0_37, %c0_38], %39 {strides = array<i32>} : memref<144x768xbf16, #tpu.memory_space<vmem>>, vector<16x768xbf16>,
    %c0_39 = arith.constant 0 : index
    %c1_40 = arith.constant 1 : index
    %41 = vector.load %arg11[%c0_39, %c1_40] : memref<16x896xbf16, #tpu.memory_space<vmem>>, vector<16x768xbf16>
    %c16_41 = arith.constant 16 : index
    %c0_42 = arith.constant 0 : index
    %42 = vector.load %arg12[%c16_41, %c0_42] : memref<144x768xbf16, #tpu.memory_space<vmem>>, vector<16x768xbf16>
    tpu.vector_store %arg12[%c16_41, %c0_42], %41 {strides = array<i32>} : memref<144x768xbf16, #tpu.memory_space<vmem>>, vector<16x768xbf16>,
    %c0_43 = arith.constant 0 : index
    %c2_44 = arith.constant 2 : index
    %43 = vector.load %arg11[%c0_43, %c2_44] : memref<16x896xbf16, #tpu.memory_space<vmem>>, vector<16x768xbf16>
    %c32_45 = arith.constant 32 : index
    %c0_46 = arith.constant 0 : index
    %44 = vector.load %arg12[%c32_45, %c0_46] : memref<144x768xbf16, #tpu.memory_space<vmem>>, vector<16x768xbf16>
    tpu.vector_store %arg12[%c32_45, %c0_46], %43 {strides = array<i32>} : memref<144x768xbf16, #tpu.memory_space<vmem>>, vector<16x768xbf16>,
    %c0_47 = arith.constant 0 : index
    %c18_48 = arith.constant 18 : index
    %45 = vector.load %arg11[%c0_47, %c18_48] : memref<16x896xbf16, #tpu.memory_space<vmem>>, vector<16x768xbf16>
    %c48_49 = arith.constant 48 : index
    %c0_50 = arith.constant 0 : index
    %46 = vector.load %arg12[%c48_49, %c0_50] : memref<144x768xbf16, #tpu.memory_space<vmem>>, vector<16x768xbf16>
    tpu.vector_store %arg12[%c48_49, %c0_50], %45 {strides = array<i32>} : memref<144x768xbf16, #tpu.memory_space<vmem>>, vector<16x768xbf16>,
    %c0_51 = arith.constant 0 : index
    %c19_52 = arith.constant 19 : index
    %47 = vector.load %arg11[%c0_51, %c19_52] : memref<16x896xbf16, #tpu.memory_space<vmem>>, vector<16x768xbf16>
    %c64_53 = arith.constant 64 : index
    %c0_54 = arith.constant 0 : index
    %48 = vector.load %arg12[%c64_53, %c0_54] : memref<144x768xbf16, #tpu.memory_space<vmem>>, vector<16x768xbf16>
    tpu.vector_store %arg12[%c64_53, %c0_54], %47 {strides = array<i32>} : memref<144x768xbf16, #tpu.memory_space<vmem>>, vector<16x768xbf16>,
    %c0_55 = arith.constant 0 : index
    %c20_56 = arith.constant 20 : index
    %49 = vector.load %arg11[%c0_55, %c20_56] : memref<16x896xbf16, #tpu.memory_space<vmem>>, vector<16x768xbf16>
    %c80_57 = arith.constant 80 : index
    %c0_58 = arith.constant 0 : index
    %50 = vector.load %arg12[%c80_57, %c0_58] : memref<144x768xbf16, #tpu.memory_space<vmem>>, vector<16x768xbf16>
    tpu.vector_store %arg12[%c80_57, %c0_58], %49 {strides = array<i32>} : memref<144x768xbf16, #tpu.memory_space<vmem>>, vector<16x768xbf16>,
    %c0_59 = arith.constant 0 : index
    %c36_60 = arith.constant 36 : index
    %51 = vector.load %arg11[%c0_59, %c36_60] : memref<16x896xbf16, #tpu.memory_space<vmem>>, vector<16x768xbf16>
    %c96_61 = arith.constant 96 : index
    %c0_62 = arith.constant 0 : index
    %52 = vector.load %arg12[%c96_61, %c0_62] : memref<144x768xbf16, #tpu.memory_space<vmem>>, vector<16x768xbf16>
    tpu.vector_store %arg12[%c96_61, %c0_62], %51 {strides = array<i32>} : memref<144x768xbf16, #tpu.memory_space<vmem>>, vector<16x768xbf16>,
    %c0_63 = arith.constant 0 : index
    %c37_64 = arith.constant 37 : index
    %53 = vector.load %arg11[%c0_63, %c37_64] : memref<16x896xbf16, #tpu.memory_space<vmem>>, vector<16x768xbf16>
    %c112_65 = arith.constant 112 : index
    %c0_66 = arith.constant 0 : index
    %54 = vector.load %arg12[%c112_65, %c0_66] : memref<144x768xbf16, #tpu.memory_space<vmem>>, vector<16x768xbf16>
    tpu.vector_store %arg12[%c112_65, %c0_66], %53 {strides = array<i32>} : memref<144x768xbf16, #tpu.memory_space<vmem>>, vector<16x768xbf16>,
    %c0_67 = arith.constant 0 : index
    %c38_68 = arith.constant 38 : index
    %55 = vector.load %arg11[%c0_67, %c38_68] : memref<16x896xbf16, #tpu.memory_space<vmem>>, vector<16x768xbf16>
    %c128_69 = arith.constant 128 : index
    %c0_70 = arith.constant 0 : index
    %56 = vector.load %arg12[%c128_69, %c0_70] : memref<144x768xbf16, #tpu.memory_space<vmem>>, vector<16x768xbf16>
    tpu.vector_store %arg12[%c128_69, %c0_70], %55 {strides = array<i32>} : memref<144x768xbf16, #tpu.memory_space<vmem>>, vector<16x768xbf16>,
    %c0_71 = arith.constant 0 : index
    %c0_72 = arith.constant 0 : index
    %57 = vector.load %arg6[%c0_71, %c0_72] : memref<32x144xbf16, #tpu.memory_space<vmem>>, vector<32x144xbf16>
    %c0_73 = arith.constant 0 : index
    %c0_74 = arith.constant 0 : index
    %58 = vector.load %arg12[%c0_73, %c0_74] : memref<144x768xbf16, #tpu.memory_space<vmem>>, vector<144x768xbf16>
    %cst_75 = arith.constant dense<0.000000e+00> : vector<32x768xf32>
    %59 = tpu.matmul %57, %58, %cst_75 {dimension_numbers = #tpu.dot_dimension_numbers<[1], [0], [0], [1], [0, 0, 1, 1], [], []>} : vector<32x144xbf16>, vector<144x768xbf16>, vector<32x768xf32> -> vector<32x768xf32>
    %c0_76 = arith.constant 0 : index
    %c0_77 = arith.constant 0 : index
    %60 = vector.load %arg7[%c0_76, %c0_77] : memref<32x1xf32, #tpu.memory_space<vmem>>, vector<32x1xf32>
    %61 = vector.broadcast %60 : vector<32x1xf32> to vector<32x768xf32>
    %62 = arith.mulf %59, %61 : vector<32x768xf32>
    %c0_78 = arith.constant 0 : index
    %c0_79 = arith.constant 0 : index
    %63 = vector.load %arg8[%c0_78, %c0_79] : memref<32x1xf32, #tpu.memory_space<vmem>>, vector<32x1xf32>
    %64 = vector.broadcast %63 : vector<32x1xf32> to vector<32x768xf32>
    %65 = arith.addf %62, %64 : vector<32x768xf32>
    %cst_80 = arith.constant 0.000000e+00 : f32
    %66 = vector.broadcast %cst_80 : f32 to vector<32x768xf32>
    %67 = arith.cmpf oge, %65, %66 : vector<32x768xf32>
    %cst_81 = arith.constant 1.000000e-01 : f32
    %68 = vector.broadcast %cst_81 : f32 to vector<32x768xf32>
    %69 = arith.mulf %68, %65 : vector<32x768xf32>
    %70 = arith.select %67, %65, %69 : vector<32x768xi1>, vector<32x768xf32>
    %c0_82 = arith.constant 0 : index
    %c0_83 = arith.constant 0 : index
    %71 = vector.load %arg9[%c0_82, %c0_83] : memref<1x768xf32, #tpu.memory_space<vmem>>, vector<1x768xf32>
    %72 = vector.broadcast %71 : vector<1x768xf32> to vector<32x768xf32>
    %73 = arith.mulf %70, %72 : vector<32x768xf32>
    %74 = arith.truncf %73 : vector<32x768xf32> to vector<32x768xbf16>
    %c0_84 = arith.constant 0 : index
    %c0_85 = arith.constant 0 : index
    %75 = vector.load %arg10[%c0_84, %c0_85] : memref<32x896xbf16, #tpu.memory_space<vmem>>, vector<32x768xbf16>
    tpu.vector_store %arg10[%c0_84, %c0_85], %74 {strides = array<i32>} : memref<32x896xbf16, #tpu.memory_space<vmem>>, vector<32x768xbf16>,
    %cst_86 = arith.constant 0.000000e+00 : bf16
    %76 = vector.broadcast %cst_86 : bf16 to vector<32x128xbf16>
    %c0_87 = arith.constant 0 : index
    %c768_88 = arith.constant 768 : index
    %77 = vector.load %arg10[%c0_87, %c768_88] : memref<32x896xbf16, #tpu.memory_space<vmem>>, vector<32x128xbf16>
    tpu.vector_store %arg10[%c0_87, %c768_88], %76 {strides = array<i32>} : memref<32x896xbf16, #tpu.memory_space<vmem>>, vector<32x128xbf16>,
    return
  }
  func.func @transform_0(%arg0: i32) -> (i32, i32) {
    %c0_i32 = arith.constant 0 : i32
    %c0_i32_0 = arith.constant 0 : i32
    %c0_i32_1 = arith.constant 0 : i32
    return %c0_i32, %c0_i32_0 : i32, i32
  }
  func.func @transform_1(%arg0: i32) -> (i32, i32) {
    %c0_i32 = arith.constant 0 : i32
    %c0_i32_0 = arith.constant 0 : i32
    %c0_i32_1 = arith.constant 0 : i32
    return %c0_i32, %c0_i32_0 : i32, i32
  }
  func.func @transform_2(%arg0: i32) -> (i32, i32) {
    %c0_i32 = arith.constant 0 : i32
    %c0_i32_0 = arith.constant 0 : i32
    %c0_i32_1 = arith.constant 0 : i32
    return %c0_i32, %c0_i32_0 : i32, i32
  }
  func.func @transform_3(%arg0: i32) -> (i32, i32) {
    %c0_i32 = arith.constant 0 : i32
    %c0_i32_0 = arith.constant 0 : i32
    %c0_i32_1 = arith.constant 0 : i32
    return %c0_i32, %c0_i32_0 : i32, i32
  }
  func.func @transform_4(%arg0: i32) -> (i32, i32) {
    %c0_i32 = arith.constant 0 : i32
    %c0_i32_0 = arith.constant 0 : i32
    %c0_i32_1 = arith.constant 0 : i32
    return %c0_i32, %c0_i32_0 : i32, i32
  }
  func.func @transform_5(%arg0: i32) -> (i32, i32) {
    %c0_i32 = arith.constant 0 : i32
    %c0_i32_0 = arith.constant 0 : i32
    %c0_i32_1 = arith.constant 0 : i32
    return %c0_i32, %c0_i32_0 : i32, i32
  }
  func.func @transform_6(%arg0: i32) -> (i32, i32) {
    %c0_i32 = arith.constant 0 : i32
    %c0_i32_0 = arith.constant 0 : i32
    %c0_i32_1 = arith.constant 0 : i32
    return %c0_i32, %c0_i32_0 : i32, i32
  }
  func.func @transform_7(%arg0: i32) -> (i32, i32) {
    %c0_i32 = arith.constant 0 : i32
    %c0_i32_0 = arith.constant 0 : i32
    %c0_i32_1 = arith.constant 0 : i32
    return %c0_i32, %c0_i32_0 : i32, i32
  }
  func.func @transform_8(%arg0: i32) -> (i32, i32) {
    %c0_i32 = arith.constant 0 : i32
    %c0_i32_0 = arith.constant 0 : i32
    %c0_i32_1 = arith.constant 0 : i32
    return %c0_i32, %c0_i32_0 : i32, i32
  }
  func.func @transform_9(%arg0: i32) -> (i32, i32) {
    %c0_i32 = arith.constant 0 : i32
    %c0_i32_0 = arith.constant 0 : i32
    %c0_i32_1 = arith.constant 0 : i32
    return %c0_i32, %c0_i32_0 : i32, i32
  }
}

</mosaic_0001>

<bundles_post_ra>
// kernel: tpu_custom_call.1
= control target key start
LH: loop header
LB: loop body
LE: loop exit
PB: predicated region body
PF: predicated region fallthrough
CT: control target
= control target key end

     0   :  { %14 = vsyncpa [#allocation5], 0  ;;  %s2882_s0 = inlined_call_operand.vmem [shape: bf16[16,896], index: 0, kind: input, shape index: {}]   ;;  %s2883_s1 = inlined_call_operand.hbm [shape: bf16[16,144], index: 1, kind: input, shape index: {}]   ;;  %s2884_s2 = inlined_call_operand.vmem [shape: f32[16,1], index: 2, kind: input, shape index: {}]   ;;  %s2885_s3 = inlined_call_operand.vmem [shape: f32[16,1], index: 3, kind: input, shape index: {}]   ;;  %s2886_s4 = inlined_call_operand.vmem [shape: f32[1,768], index: 4, kind: input, shape index: {}]   ;;  %s2887_s5 = inlined_call_operand.vmem [shape: bf16[32,144], index: 5, kind: input, shape index: {}]   ;;  %s2888_s6 = inlined_call_operand.vmem [shape: f32[32,1], index: 6, kind: input, shape index: {}]   ;;  %s2889_s7 = inlined_call_operand.vmem [shape: f32[32,1], index: 7, kind: input, shape index: {}]   ;;  %s2890_s8 = inlined_call_operand.vmem [shape: f32[1,768], index: 8, kind: input, shape index: {}]   ;;  %s2891_s9 = inlined_call_operand.hbm [shape: bf16[32,896], index: 9, kind: output, shape index: {}]  }
   0x1   :  { %15 = vsyncpa [#allocation6], 0  ;;  %s2131_s30 = smov [#allocation4]   ;;  %s2083_s13 = scalar_lea.hbm %s2883_s1, 256 }
   0x2   :  { %s23_s10 = sshll.u32 %s2131_s30, 4  ;;  %p2084_p0 = scmp.ne.s32.totalorder %s2883_s1, %s2083_s13  ;;  %s24_s10 = int_to_ptr.vmem [resolvable:$true] %s23_s10 }
   0x3   :  { %p2087_p1 = scmp.lt.u32.totalorder %s2083_s13, %s2883_s1 }
   0x5   :  { %p2089_p2 = pnand %p2087_p1, %p2084_p0 }
   0x7   :  { %2092 = shalt.err (!%p2089_p2)
}
   0x8   :  { %s2093_s18 = scalar_lea.vmem %s24_s10, 256  ;;  %p2098_p4 = scmp.lt.s32.totalorder %s24_s10, %s24_s10 }
   0x9   :  { %p2094_p3 = scmp.ne.s32.totalorder %s24_s10, %s2093_s18  ;;  %p2099_p5 = scmp.lt.s32.totalorder %s2093_s18, %s2093_s18 }
   0xb   :  { %p2100_p6 = por %p2099_p5, %p2098_p4 }
   0xd   :  { %p2101_p7 = pnand %p2100_p6, %p2094_p3 }
   0xf   :  { %2104 = shalt.err (!%p2101_p7)
}
  0x10   :  { %s2132_s19 = smov 128   ;;  %s2133_s20 = smov 8  }
  0x11   :  { %29 = dma.hbm_to_vmem [thread:$0]  %s2883_s1, 256, %s24_s10, [#allocation5], %s2132_s19, %s2132_s19, %s2133_s20  }
  0x12   :  { %2127 = dma.done.wait [#allocation5], 256  }
  0x13   :  { %2128 = vsyncadd [#allocation5], 4294967040  ;;  %v2057_v0 = vld [vmem:[%s2882_s0 + $0x4] ss:$28 sps:$4 sm:$0xff]   ;;  %s2134_s27 = smov 127   ;;  %s2135_s12 = smov 126  }
  0x14   :  { %v2059_v1 = vld [vmem:[%s2882_s0] ss:$28 sps:$4 sm:$0xff]   ;;  %129 = vrot.lane.b32.xlu0 %v2057_v0, %s2134_s27  ;;  %v2060_v2 = vld [vmem:[%s2882_s0 + $0x8] ss:$28 sps:$4 sm:$0xff]   ;;  %719 = vmatprep.subr.bf16.mxu0 %v2057_v0  ;;  %v2226_v4 = vld [vmem:[%s2882_s0 + $0x10] ss:$28 sps:$4 sm:$0xff]  }
  0x15   :  { %v2062_v3 = vld [vmem:[%s2882_s0 + $0xc] ss:$28 sps:$4 sm:$0xff]   ;;  %127 = vrot.lane.b32.xlu1 %v2059_v1, %s2134_s27  ;;  %720 = vmatpush1.bf16.msra.mxu0 %v2059_v1  ;;  %s2136_s13 = smov 110   ;;  %s2137_s14 = smov 109   ;;  %vm715_vm0 = vcmask 130048   ;;  %v2142_v14 = vmov 0  }
  0x16   :  { %762 = vmatprep.subr.bf16.mxu1 %v2062_v3  ;;  %s2138_s15 = smov 108   ;;  %s2139_s16 = smov 92   ;;  %v2263_v5 = vld [vmem:[#allocation4 + $0x4] ss:$8 sps:$4 sm:$0xff]   ;;  %v2280_v6 = vld [vmem:[%s2882_s0 + $0x14] ss:$28 sps:$4 sm:$0xff]   ;;  %2056 = vset.pattern.permute.xlu1 %v2142_v14 }
  0x17   :  { %763 = vmatpush1.bf16.msra.mxu1 %v2060_v2  ;;  %s2140_s17 = smov 91   ;;  %2003 = vmatprep.mubr.msk.bf16.mxu0 %vm715_vm0, %v2263_v5  ;;  %s2141_s18 = smov 90   ;;  %v2066_v7 = vld [vmem:[%s2882_s0 + $0x18] ss:$28 sps:$4 sm:$0xff]   ;;  %1918 = vst [vmem:[#allocation7 + $0x18] sm:$0xf] %v2142_v14 }
  0x18   :  { %131 = vrot.lane.b32.xlu0 %v2060_v2, %s2134_s27  ;;  %2004 = vmatprep.mubr.msk.bf16.mxu1 %vm715_vm0, %v2263_v5  ;;  %v2067_v8 = vld [vmem:[%s2882_s0 + $0x18] ss:$28 sps:$4 sm:$0xff]   ;;  %1919 = vst [vmem:[#allocation7 + $0x34] sm:$0xf] %v2142_v14  ;;  %1920 = vst [vmem:[#allocation7 + $0x50] sm:$0xf] %v2142_v14 }
  0x19   :  { %133 = vrot.lane.b32.xlu1 %v2062_v3, %s2134_s27  ;;  %v2068_v9 = vld [vmem:[%s2882_s0 + $0x18] ss:$28 sps:$4 sm:$0xff]   ;;  %1921 = vst [vmem:[#allocation7 + $0x6c] sm:$0xf] %v2142_v14  ;;  %2055 = vset.pattern.permute.xlu0 %v2142_v14  ;;  %v848_v16 = vld [vmem:[%s2884_s2] sm:$0xff]  ;;  %v849_v17 = vld [vmem:[%s2884_s2 + $0x8] sm:$0xff] }
  0x1a   :  { %v2069_v10 = vld [vmem:[%s2882_s0 + $0x18] ss:$28 sps:$4 sm:$0xff]   ;;  %v873_v18 = vld [vmem:[%s2885_s3 + $0x8] sm:$0xff]  ;;  %v872_v20 = vld [vmem:[%s2885_s3] sm:$0xff]  ;;  %vm141_vm1 = vcmask 1039360   ;;  %vm211_vm2 = vcmask 1031168  }
  0x1b   :  { %v2070_v11 = vld [vmem:[%s2882_s0 + $0x18] ss:$28 sps:$4 sm:$0xff]   ;;  %vm281_vm3 = vcmask 900096   ;;  %vm351_vm4 = vcmask 891904   ;;  %vm421_vm5 = vcmask 883712   ;;  %vm491_vm6 = vcmask 752640  }
  0x1c   :  { %135 = vrot.lane.b32.xlu0 %v2226_v4, %s2134_s27  ;;  %v2071_v12 = vld [vmem:[%s2882_s0 + $0x18] ss:$28 sps:$4 sm:$0xff]   ;;  %vm561_vm7 = vcmask 744448   ;;  %vm631_vm8 = vcmask 736256  }
  0x1d   :  { %199 = vrot.lane.b32.xlu1 %v2057_v0, %s2135_s12  ;;  %v2072_v13 = vld [vmem:[%s2882_s0 + $0x18] ss:$28 sps:$4 sm:$0xff]  }
  0x1e   :  { %v2073_v15 = vld [vmem:[%s2882_s0 + $0x18] ss:$28 sps:$4 sm:$0xff]  }
  0x20   :  { %201 = vrot.lane.b32.xlu0 %v2060_v2, %s2135_s12 }
  0x21   :  { %197 = vrot.lane.b32.xlu1 %v2059_v1, %s2135_s12 }
  0x24   :  { %203 = vrot.lane.b32.xlu0 %v2062_v3, %s2135_s12 }
  0x25   :  { %205 = vrot.lane.b32.xlu1 %v2226_v4, %s2135_s12 }
  0x28   :  { %269 = vrot.lane.b32.xlu0 %v2057_v0, %s2136_s13 }
  0x29   :  { %271 = vrot.lane.b32.xlu1 %v2060_v2, %s2136_s13 }
  0x2c   :  { %267 = vrot.lane.b32.xlu0 %v2059_v1, %s2136_s13 }
  0x2d   :  { %273 = vrot.lane.b32.xlu1 %v2062_v3, %s2136_s13 }
  0x30   :  { %275 = vrot.lane.b32.xlu0 %v2226_v4, %s2136_s13 }
  0x31   :  { %339 = vrot.lane.b32.xlu1 %v2057_v0, %s2137_s14 }
  0x34   :  { %341 = vrot.lane.b32.xlu0 %v2060_v2, %s2137_s14 }
  0x35   :  { %337 = vrot.lane.b32.xlu1 %v2059_v1, %s2137_s14 }
  0x38   :  { %343 = vrot.lane.b32.xlu0 %v2062_v3, %s2137_s14 }
  0x39   :  { %345 = vrot.lane.b32.xlu1 %v2226_v4, %s2137_s14 }
  0x3c   :  { %409 = vrot.lane.b32.xlu0 %v2057_v0, %s2138_s15 }
  0x3d   :  { %411 = vrot.lane.b32.xlu1 %v2060_v2, %s2138_s15 }
  0x40   :  { %407 = vrot.lane.b32.xlu0 %v2059_v1, %s2138_s15 }
  0x41   :  { %413 = vrot.lane.b32.xlu1 %v2062_v3, %s2138_s15 }
  0x44   :  { %415 = vrot.lane.b32.xlu0 %v2226_v4, %s2138_s15 }
  0x45   :  { %479 = vrot.lane.b32.xlu1 %v2057_v0, %s2139_s16 }
  0x48   :  { %481 = vrot.lane.b32.xlu0 %v2060_v2, %s2139_s16 }
  0x49   :  { %477 = vrot.lane.b32.xlu1 %v2059_v1, %s2139_s16 }
  0x4c   :  { %483 = vrot.lane.b32.xlu0 %v2062_v3, %s2139_s16 }
  0x4d   :  { %485 = vrot.lane.b32.xlu1 %v2226_v4, %s2139_s16 }
  0x50   :  { %549 = vrot.lane.b32.xlu0 %v2057_v0, %s2140_s17 }
  0x51   :  { %551 = vrot.lane.b32.xlu1 %v2060_v2, %s2140_s17 }
  0x54   :  { %547 = vrot.lane.b32.xlu0 %v2059_v1, %s2140_s17 }
  0x55   :  { %553 = vrot.lane.b32.xlu1 %v2062_v3, %s2140_s17 }
  0x58   :  { %555 = vrot.lane.b32.xlu0 %v2226_v4, %s2140_s17 }
  0x59   :  { %619 = vrot.lane.b32.xlu1 %v2057_v0, %s2141_s18 }
  0x5c   :  { %621 = vrot.lane.b32.xlu0 %v2060_v2, %s2141_s18 }
  0x5d   :  { %617 = vrot.lane.b32.xlu1 %v2059_v1, %s2141_s18 }
  0x60   :  { %623 = vrot.lane.b32.xlu0 %v2062_v3, %s2141_s18 }
  0x61   :  { %625 = vrot.lane.b32.xlu1 %v2226_v4, %s2141_s18 }
  0x64   :  { %137 = vrot.lane.b32.xlu0 %v2280_v6, %s2134_s27 }
  0x65   :  { %139 = vrot.lane.b32.xlu1 %v2066_v7, %s2134_s27 }
  0x68   :  { %207 = vrot.lane.b32.xlu0 %v2280_v6, %s2135_s12 }
  0x69   :  { %209 = vrot.lane.b32.xlu1 %v2067_v8, %s2135_s12 }
  0x6c   :  { %277 = vrot.lane.b32.xlu0 %v2280_v6, %s2136_s13 }
  0x6d   :  { %279 = vrot.lane.b32.xlu1 %v2068_v9, %s2136_s13 }
  0x70   :  { %347 = vrot.lane.b32.xlu0 %v2280_v6, %s2137_s14 }
  0x71   :  { %349 = vrot.lane.b32.xlu1 %v2069_v10, %s2137_s14 }
  0x74   :  { %417 = vrot.lane.b32.xlu0 %v2280_v6, %s2138_s15 }
  0x75   :  { %419 = vrot.lane.b32.xlu1 %v2070_v11, %s2138_s15 }
  0x78   :  { %487 = vrot.lane.b32.xlu0 %v2280_v6, %s2139_s16 }
  0x79   :  { %489 = vrot.lane.b32.xlu1 %v2071_v12, %s2139_s16 }
  0x7c   :  { %557 = vrot.lane.b32.xlu0 %v2280_v6, %s2140_s17 }
  0x7d   :  { %559 = vrot.lane.b32.xlu1 %v2072_v13, %s2140_s17 }
  0x80   :  { %627 = vrot.lane.b32.xlu0 %v2280_v6, %s2141_s18 }
  0x81   :  { %629 = vrot.lane.b32.xlu1 %v2073_v15, %s2141_s18 }
  0x84   :  { %852 = vperm.xlu0 %2055, %v848_v16  }
  0x85   :  { %857 = vperm.xlu1 %2056, %v849_v17  }
  0x86   :  { %v130_v19 = vpop.permute.xlu0 %129 }
  0x87   :  { %v128_v21 = vpop.permute.xlu1 %127 }
  0x88   :  { %881 = vperm.xlu0 %2055, %v873_v18   ;;  %v142_v25 = vsel %vm141_vm1, %v128_v21, %v130_v19 }
  0x89   :  { %876 = vperm.xlu1 %2056, %v872_v20  }
  0x8a   :  { %v132_v22 = vpop.permute.xlu0 %131 }
  0x8b   :  { %v134_v23 = vpop.permute.xlu1 %133  ;;  %v143_v24 = vsel %vm141_vm1, %v130_v19, %v132_v22 }
  0x8c   :  { %721 = vmatprep.subr.bf16.mxu0 %v143_v24  ;;  %1027 = vrot.lane.b32.xlu0 %v2142_v14, %s2134_s27  ;;  %v144_v29 = vsel %vm141_vm1, %v132_v22, %v134_v23 }
  0x8d   :  { %722 = vmatpush1.bf16.msra.mxu0 %v142_v25 }
  0x8e   :  { %v2354_v26 = vpop.permute.xlu0 %135 }
  0x8f   :  { %v200_v27 = vpop.permute.xlu1 %199  ;;  %v145_v28 = vsel %vm141_vm1, %v134_v23, %v2354_v26 }
  0x90   :  { %764 = vmatprep.subr.bf16.mxu1 %v145_v28  ;;  %1073 = vrot.lane.b32.xlu0 %v2142_v14, %s2135_s12 }
  0x91   :  { %765 = vmatpush1.bf16.msra.mxu1 %v144_v29  ;;  %v2076_v29 = vld [vmem:[#allocation4] ss:$8 sps:$4 sm:$0xff]  }
  0x92   :  { %v202_v30 = vpop.permute.xlu0 %201 }
  0x93   :  { %v198_v31 = vpop.permute.xlu1 %197  ;;  %v213_v32 = vsel %vm211_vm2, %v200_v27, %v202_v30 }
  0x94   :  { %723 = vmatprep.subr.bf16.mxu0 %v213_v32  ;;  %v212_v33 = vsel %vm211_vm2, %v198_v31, %v200_v27  ;;  %1119 = vrot.lane.b32.xlu0 %v2142_v14, %s2136_s13 }
  0x95   :  { %724 = vmatpush1.bf16.msra.mxu0 %v212_v33 }
  0x96   :  { %v204_v34 = vpop.permute.xlu0 %203 }
  0x97   :  { %v2365_v35 = vpop.permute.xlu1 %205  ;;  %v214_v36 = vsel %vm211_vm2, %v202_v30, %v204_v34 }
  0x98   :  { %v215_v37 = vsel %vm211_vm2, %v204_v34, %v2365_v35  ;;  %1165 = vrot.lane.b32.xlu0 %v2142_v14, %s2137_s14 }
  0x99   :  { %766 = vmatprep.subr.bf16.mxu1 %v215_v37 }
  0x9a   :  { %767 = vmatpush1.bf16.msra.mxu1 %v214_v36  ;;  %v270_v38 = vpop.permute.xlu0 %269 }
  0x9b   :  { %v272_v39 = vpop.permute.xlu1 %271 }
  0x9c   :  { %v283_v40 = vsel %vm281_vm3, %v270_v38, %v272_v39 }
  0x9d   :  { %725 = vmatprep.subr.bf16.mxu0 %v283_v40 }
  0x9e   :  { %v268_v41 = vpop.permute.xlu0 %267 }
  0x9f   :  { %v274_v42 = vpop.permute.xlu1 %273  ;;  %v282_v43 = vsel %vm281_vm3, %v268_v41, %v270_v38 }
  0xa0   :  { %726 = vmatpush1.bf16.msra.mxu0 %v282_v43  ;;  %v284_v47 = vsel %vm281_vm3, %v272_v39, %v274_v42 }
  0xa2   :  { %v2374_v44 = vpop.permute.xlu0 %275 }
  0xa3   :  { %v340_v45 = vpop.permute.xlu1 %339  ;;  %v285_v46 = vsel %vm281_vm3, %v274_v42, %v2374_v44 }
  0xa4   :  { %768 = vmatprep.subr.bf16.mxu1 %v285_v46 }
  0xa5   :  { %769 = vmatpush1.bf16.msra.mxu1 %v284_v47 }
  0xa6   :  { %v342_v48 = vpop.permute.xlu0 %341 }
  0xa7   :  { %v338_v49 = vpop.permute.xlu1 %337  ;;  %v353_v50 = vsel %vm351_vm4, %v340_v45, %v342_v48 }
  0xa8   :  { %727 = vmatprep.subr.bf16.mxu0 %v353_v50  ;;  %v352_v51 = vsel %vm351_vm4, %v338_v49, %v340_v45 }
  0xa9   :  { %728 = vmatpush1.bf16.msra.mxu0 %v352_v51 }
  0xaa   :  { %v344_v52 = vpop.permute.xlu0 %343 }
  0xab   :  { %v2381_v53 = vpop.permute.xlu1 %345  ;;  %v354_v54 = vsel %vm351_vm4, %v342_v48, %v344_v52 }
  0xac   :  { %v355_v55 = vsel %vm351_vm4, %v344_v52, %v2381_v53 }
  0xad   :  { %770 = vmatprep.subr.bf16.mxu1 %v355_v55 }
  0xae   :  { %771 = vmatpush1.bf16.msra.mxu1 %v354_v54  ;;  %v410_v56 = vpop.permute.xlu0 %409 }
  0xaf   :  { %v412_v57 = vpop.permute.xlu1 %411 }
  0xb0   :  { %v423_v58 = vsel %vm421_vm5, %v410_v56, %v412_v57 }
  0xb1   :  { %729 = vmatprep.subr.bf16.mxu0 %v423_v58 }
  0xb2   :  { %v408_v59 = vpop.permute.xlu0 %407 }
  0xb3   :  { %v414_v60 = vpop.permute.xlu1 %413  ;;  %v422_v61 = vsel %vm421_vm5, %v408_v59, %v410_v56 }
  0xb4   :  { %730 = vmatpush1.bf16.msra.mxu0 %v422_v61  ;;  %v424_v1 = vsel %vm421_vm5, %v412_v57, %v414_v60 }
  0xb6   :  { %v2388_v62 = vpop.permute.xlu0 %415 }
  0xb7   :  { %v480_v63 = vpop.permute.xlu1 %479  ;;  %v425_v0 = vsel %vm421_vm5, %v414_v60, %v2388_v62 }
  0xb8   :  { %772 = vmatprep.subr.bf16.mxu1 %v425_v0 }
  0xb9   :  { %773 = vmatpush1.bf16.msra.mxu1 %v424_v1  ;;  %v2444_v1 = vld [vmem:[%s2886_s4] sm:$0x3f] }
  0xba   :  { %v482_v2 = vpop.permute.xlu0 %481 }
  0xbb   :  { %v478_v3 = vpop.permute.xlu1 %477  ;;  %v493_v7 = vsel %vm491_vm6, %v480_v63, %v482_v2 }
  0xbc   :  { %731 = vmatprep.subr.bf16.mxu0 %v493_v7  ;;  %v492_v8 = vsel %vm491_vm6, %v478_v3, %v480_v63 }
  0xbd   :  { %732 = vmatpush1.bf16.msra.mxu0 %v492_v8 }
  0xbe   :  { %v484_v9 = vpop.permute.xlu0 %483 }
  0xbf   :  { %v2395_v10 = vpop.permute.xlu1 %485  ;;  %v494_v11 = vsel %vm491_vm6, %v482_v2, %v484_v9 }
  0xc0   :  { %v495_v12 = vsel %vm491_vm6, %v484_v9, %v2395_v10 }
  0xc1   :  { %774 = vmatprep.subr.bf16.mxu1 %v495_v12 }
  0xc2   :  { %775 = vmatpush1.bf16.msra.mxu1 %v494_v11  ;;  %v550_v13 = vpop.permute.xlu0 %549 }
  0xc3   :  { %v552_v15 = vpop.permute.xlu1 %551 }
  0xc4   :  { %v563_v16 = vsel %vm561_vm7, %v550_v13, %v552_v15 }
  0xc5   :  { %733 = vmatprep.subr.bf16.mxu0 %v563_v16 }
  0xc6   :  { %v548_v17 = vpop.permute.xlu0 %547 }
  0xc7   :  { %v554_v18 = vpop.permute.xlu1 %553  ;;  %v562_v19 = vsel %vm561_vm7, %v548_v17, %v550_v13 }
  0xc8   :  { %734 = vmatpush1.bf16.msra.mxu0 %v562_v19  ;;  %v564_v23 = vsel %vm561_vm7, %v552_v15, %v554_v18 }
  0xca   :  { %v2402_v20 = vpop.permute.xlu0 %555 }
  0xcb   :  { %v620_v21 = vpop.permute.xlu1 %619  ;;  %v565_v22 = vsel %vm561_vm7, %v554_v18, %v2402_v20 }
  0xcc   :  { %776 = vmatprep.subr.bf16.mxu1 %v565_v22 }
  0xcd   :  { %777 = vmatpush1.bf16.msra.mxu1 %v564_v23 }
  0xce   :  { %v622_v24 = vpop.permute.xlu0 %621 }
  0xcf   :  { %v618_v25 = vpop.permute.xlu1 %617  ;;  %v633_v27 = vsel %vm631_vm8, %v620_v21, %v622_v24 }
  0xd0   :  { %735 = vmatprep.subr.bf16.mxu0 %v633_v27  ;;  %v632_v28 = vsel %vm631_vm8, %v618_v25, %v620_v21 }
  0xd1   :  { %736 = vmatpush1.bf16.msra.mxu0 %v632_v28 }
  0xd2   :  { %v624_v30 = vpop.permute.xlu0 %623  ;;  %805 = vmatprep.subr.bf16.mxu0 %v2280_v6 }
  0xd3   :  { %v626_v31 = vpop.permute.xlu1 %625  ;;  %v634_v32 = vsel %vm631_vm8, %v622_v24, %v624_v30 }
  0xd4   :  { %752 = vmatmul.mubr.bf16.vlgmr.msra.gmra.mrb[0].mxu0 %v2076_v29  ;;  %v635_v33 = vsel %vm631_vm8, %v624_v30, %v626_v31 }
  0xd5   :  { %778 = vmatprep.subr.bf16.mxu1 %v635_v33  ;;  %806 = vmatpush1.bf16.msra.mxu0 %v2226_v4 }
  0xd6   :  { %779 = vmatpush1.bf16.msra.mxu1 %v634_v32  ;;  %v138_v34 = vpop.permute.xlu0 %137  ;;  %2005 = vmatprep.mubr.msk.bf16.mxu0 %vm715_vm0, %v2263_v5 }
  0xd7   :  { %v146_v36 = vsel %vm141_vm1, %v2354_v26, %v138_v34  ;;  %v140_v37 = vpop.permute.xlu1 %139 }
  0xd8   :  { %v147_v6 = vsel %vm141_vm1, %v138_v34, %v140_v37 }
  0xd9   :  { %795 = vmatmul.mubr.bf16.vlgmr.msra.gmra.mrb[0].mxu1 %v2076_v29  ;;  %807 = vmatprep.subr.bf16.mxu0 %v147_v6 }
  0xda   :  { %808 = vmatpush1.bf16.msra.mxu0 %v146_v36  ;;  %v208_v38 = vpop.permute.xlu0 %207 }
  0xdb   :  { %v216_v39 = vsel %vm211_vm2, %v2365_v35, %v208_v38  ;;  %v210_v40 = vpop.permute.xlu1 %209 }
  0xdc   :  { %v217_v4 = vsel %vm211_vm2, %v208_v38, %v210_v40 }
  0xdd   :  { %809 = vmatprep.subr.bf16.mxu0 %v217_v4 }
  0xde   :  { %810 = vmatpush1.bf16.msra.mxu0 %v216_v39  ;;  %v278_v41 = vpop.permute.xlu0 %277 }
  0xdf   :  { %v286_v5 = vsel %vm281_vm3, %v2374_v44, %v278_v41  ;;  %v280_v26 = vpop.permute.xlu1 %279 }
  0xe0   :  { %v287_v42 = vsel %vm281_vm3, %v278_v41, %v280_v26 }
  0xe1   :  { %811 = vmatprep.subr.bf16.mxu0 %v287_v42 }
  0xe2   :  { %812 = vmatpush1.bf16.msra.mxu0 %v286_v5  ;;  %v348_v43 = vpop.permute.xlu0 %347 }
  0xe3   :  { %v356_v45 = vsel %vm351_vm4, %v2381_v53, %v348_v43  ;;  %v350_v46 = vpop.permute.xlu1 %349 }
  0xe4   :  { %v357_v35 = vsel %vm351_vm4, %v348_v43, %v350_v46 }
  0xe5   :  { %813 = vmatprep.subr.bf16.mxu0 %v357_v35 }
  0xe6   :  { %814 = vmatpush1.bf16.msra.mxu0 %v356_v45  ;;  %v418_v47 = vpop.permute.xlu0 %417 }
  0xe7   :  { %v426_v48 = vsel %vm421_vm5, %v2388_v62, %v418_v47  ;;  %v420_v49 = vpop.permute.xlu1 %419  ;;  %v934_v62 = vlaneseq }
  0xe8   :  { %v427_v44 = vsel %vm421_vm5, %v418_v47, %v420_v49 }
  0xe9   :  { %815 = vmatprep.subr.bf16.mxu0 %v427_v44  ;;  %v2438_v63 = vshrl.u32 %v934_v62, 7 }
  0xea   :  { %816 = vmatpush1.bf16.msra.mxu0 %v426_v48  ;;  %v488_v50 = vpop.permute.xlu0 %487 }
  0xeb   :  { %v496_v51 = vsel %vm491_vm6, %v2395_v10, %v488_v50  ;;  %v490_v52 = vpop.permute.xlu1 %489  ;;  %v952_v0 = vsub.s32 4, %v2438_v63  ;;  %v956_v2 = vsub.s32 5, %v2438_v63  ;;  %v936_v10 = vsub.s32 0, %v2438_v63 }
  0xec   :  { %v497_v53 = vsel %vm491_vm6, %v488_v50, %v490_v52  ;;  %v940_v12 = vsub.s32 1, %v2438_v63  ;;  %v944_v28 = vsub.s32 2, %v2438_v63  ;;  %v948_v32 = vsub.s32 3, %v2438_v63 }
  0xed   :  { %817 = vmatprep.subr.bf16.mxu0 %v497_v53  ;;  %v2450_v3 = vrot.slane %v2444_v1, %v952_v0  ;;  %v2455_v7 = vrot.slane %v2444_v1, %v956_v2 }
  0xee   :  { %818 = vmatpush1.bf16.msra.mxu0 %v496_v51  ;;  %v558_v54 = vpop.permute.xlu0 %557  ;;  %v941_v25 = vrot.slane %v2444_v1, %v940_v12 }
  0xef   :  { %v566_v55 = vsel %vm561_vm7, %v2402_v20, %v558_v54  ;;  %v560_v56 = vpop.permute.xlu1 %559  ;;  %v937_v20 = vrot.slane %v2444_v1, %v936_v10 }
  0xf0   :  { %v567_v57 = vsel %vm561_vm7, %v558_v54, %v560_v56  ;;  %v945_v56 = vrot.slane %v2444_v1, %v944_v28 }
  0xf1   :  { %819 = vmatprep.subr.bf16.mxu0 %v567_v57 }
  0xf2   :  { %820 = vmatpush1.bf16.msra.mxu0 %v566_v55  ;;  %v628_v58 = vpop.permute.xlu0 %627 }
  0xf3   :  { %v636_v59 = vsel %vm631_vm8, %v626_v31, %v628_v58  ;;  %v630_v60 = vpop.permute.xlu1 %629 }
  0xf4   :  { %v637_v61 = vsel %vm631_vm8, %v628_v58, %v630_v60  ;;  %v949_v58 = vrot.slane %v2444_v1, %v948_v32 }
  0xf5   :  { %821 = vmatprep.subr.bf16.mxu0 %v637_v61 }
  0xf6   :  { %822 = vmatpush1.bf16.msra.mxu0 %v636_v59 }
  0xf9   :  { %838 = vmatmul.mubr.bf16.vlgmr.msra.gmra.mrb[4].mxu0 %v2076_v29 }
 0x103   :  { %v2459_v9 = vpop.permute.xlu0 %852 }
 0x104   :  { %v2457_v8 = vpop.permute.xlu1 %857 }
 0x107   :  { %v2472_v23 = vpop.permute.xlu0 %881 }
 0x108   :  { %v2464_v16 = vpop.permute.xlu1 %876 }
 0x1a7   :  { %v753_v11 = vpop.f32.mrb[0].mxu0 }
 0x1a8   :  { %v860_v13 = vmul.f32 %v2459_v9, %v753_v11  ;;  %v755_v15 = vpop.f32.mrb[1].mxu0 }
 0x1a9   :  { %v861_v17 = vmul.f32 %v2459_v9, %v755_v15  ;;  %v757_v18 = vpop.f32.mrb[2].mxu0 }
 0x1aa   :  { %v884_v19 = vadd.f32 %v2464_v16, %v860_v13  ;;  %v866_v21 = vmul.f32 %v2457_v8, %v757_v18  ;;  %v759_v22 = vpop.f32.mrb[3].mxu0 }
 0x1ab   :  { %v885_v24 = vadd.f32 %v2464_v16, %v861_v17  ;;  %v867_v27 = vmul.f32 %v2457_v8, %v759_v22 }
 0x1ac   :  { %vm896_vm9 = vcmp.ge.f32.partialorder %v884_v19, 0.0  ;;  %v908_v29 = vmul.f32 0.1, %v884_v19  ;;  %v890_v30 = vadd.f32 %v2472_v23, %v866_v21  ;;  %v796_v31 = vpop.f32.mrb[0].mxu1 }
 0x1ad   :  { %vm897_vm10 = vcmp.ge.f32.partialorder %v885_v24, 0.0  ;;  %v909_v33 = vmul.f32 0.1, %v885_v24  ;;  %v891_v34 = vadd.f32 %v2472_v23, %v867_v27  ;;  %v862_v36 = vmul.f32 %v2459_v9, %v796_v31  ;;  %v798_v37 = vpop.f32.mrb[1].mxu1 }
 0x1ae   :  { %v920_v6 = vsel %vm896_vm9, %v884_v19, %v908_v29  ;;  %vm902_vm11 = vcmp.ge.f32.partialorder %v890_v30, 0.0  ;;  %v914_v38 = vmul.f32 0.1, %v890_v30  ;;  %v863_v39 = vmul.f32 %v2459_v9, %v798_v37  ;;  %v800_v40 = vpop.f32.mrb[2].mxu1 }
 0x1af   :  { %v964_v4 = vmul.f32 %v937_v20, %v920_v6  ;;  %v921_v41 = vsel %vm897_vm10, %v885_v24, %v909_v33  ;;  %vm903_vm12 = vcmp.ge.f32.partialorder %v891_v34, 0.0  ;;  %v915_v5 = vmul.f32 0.1, %v891_v34  ;;  %v802_v26 = vpop.f32.mrb[3].mxu1 }
 0x1b0   :  { %v965_v42 = vmul.f32 %v941_v25, %v921_v41  ;;  %v926_v43 = vsel %vm902_vm11, %v890_v30, %v914_v38  ;;  %v886_v45 = vadd.f32 %v2464_v16, %v862_v36  ;;  %v887_v46 = vadd.f32 %v2464_v16, %v863_v39 }
 0x1b1   :  { %v970_v35 = vmul.f32 %v937_v20, %v926_v43  ;;  %v927_v47 = vsel %vm903_vm12, %v891_v34, %v915_v5  ;;  %v868_v48 = vmul.f32 %v2457_v8, %v800_v40  ;;  %v869_v49 = vmul.f32 %v2457_v8, %v802_v26  ;;  %v1611_v43 = vld [vmem:[%s2888_s6 + $0x8] sm:$0xff] }
 0x1b2   :  { %v971_v44 = vmul.f32 %v941_v25, %v927_v47  ;;  %vm898_vm13 = vcmp.ge.f32.partialorder %v886_v45, 0.0  ;;  %v910_v50 = vmul.f32 0.1, %v886_v45  ;;  %vm899_vm14 = vcmp.ge.f32.partialorder %v887_v46, 0.0  ;;  %v1661_v47 = vld [vmem:[%s2889_s7 + $0x18] sm:$0xff] }
 0x1b3   :  { %v2489_v51 = vpack.c.bf16 %v970_v35, %v964_v4  ;;  %v911_v52 = vmul.f32 0.1, %v887_v46  ;;  %v892_v53 = vadd.f32 %v2472_v23, %v868_v48  ;;  %v893_v54 = vadd.f32 %v2472_v23, %v869_v49  ;;  %v1610_v48 = vld [vmem:[%s2888_s6] sm:$0xff] }
 0x1b4   :  { %v2493_v55 = vpack.c.bf16 %v971_v44, %v965_v42  ;;  %v922_v57 = vsel %vm898_vm13, %v886_v45, %v910_v50  ;;  %v1612_v50 = vld [vmem:[%s2888_s6 + $0x10] sm:$0xff] }
 0x1b5   :  { %vm904_vm15 = vcmp.ge.f32.partialorder %v892_v53, 0.0  ;;  %v916_v59 = vmul.f32 0.1, %v892_v53  ;;  %1015 = vrot.lane.b32.xlu1 %v2489_v51, %s2134_s27  ;;  %v923_v60 = vsel %vm899_vm14, %v887_v46, %v911_v52  ;;  %vm905_vm9 = vcmp.ge.f32.partialorder %v893_v54, 0.0  ;;  %v1613_v46 = vld [vmem:[%s2888_s6 + $0x18] sm:$0xff] }
 0x1b6   :  { %v917_v61 = vmul.f32 0.1, %v893_v54  ;;  %1451 = vmatprep.subr.bf16.mxu1 %v2493_v55  ;;  %v966_v11 = vmul.f32 %v945_v56, %v922_v57  ;;  %v967_v17 = vmul.f32 %v949_v58, %v923_v60 }
 0x1b7   :  { %v928_v62 = vsel %vm904_vm15, %v892_v53, %v916_v59  ;;  %1452 = vmatpush1.bf16.msra.mxu1 %v2489_v51 }
 0x1b8   :  { %v972_v13 = vmul.f32 %v945_v56, %v928_v62  ;;  %v929_v15 = vsel %vm905_vm9, %v893_v54, %v917_v61  ;;  %v1660_v54 = vld [vmem:[%s2889_s7 + $0x10] sm:$0xff] }
 0x1b9   :  { %v973_v18 = vmul.f32 %v949_v58, %v929_v15 }
 0x1ba   :  { %v978_v19 = vpack.c.bf16 %v972_v13, %v966_v11 }
 0x1bb   :  { %v2505_v1 = vpack.c.bf16 %v973_v18, %v967_v17 }
 0x1bc   :  { %1019 = vrot.lane.b32.xlu0 %v978_v19, %s2134_s27  ;;  %1065 = vrot.lane.b32.xlu1 %v978_v19, %s2135_s12 }
 0x1bd   :  { %1504 = vmatprep.subr.bf16.mxu0 %v2505_v1 }
 0x1be   :  { %1505 = vmatpush1.bf16.msra.mxu0 %v978_v19 }
 0x1c0   :  { %1061 = vrot.lane.b32.xlu0 %v2489_v51, %s2135_s12  ;;  %1107 = vrot.lane.b32.xlu1 %v2489_v51, %s2136_s13 }
 0x1c4   :  { %1111 = vrot.lane.b32.xlu0 %v978_v19, %s2136_s13  ;;  %1157 = vrot.lane.b32.xlu1 %v978_v19, %s2137_s14 }
 0x1c8   :  { %1153 = vrot.lane.b32.xlu0 %v2489_v51, %s2137_s14  ;;  %1199 = vrot.lane.b32.xlu1 %v2489_v51, %s2138_s15 }
 0x1cc   :  { %1203 = vrot.lane.b32.xlu0 %v978_v19, %s2138_s15  ;;  %1249 = vrot.lane.b32.xlu1 %v978_v19, %s2139_s16  ;;  %v839_v20 = vpop.f32.mrb[4].mxu0 }
 0x1cd   :  { %v864_v21 = vmul.f32 %v2459_v9, %v839_v20  ;;  %v841_v22 = vpop.f32.mrb[5].mxu0 }
 0x1ce   :  { %v865_v24 = vmul.f32 %v2459_v9, %v841_v22  ;;  %v843_v25 = vpop.f32.mrb[6].mxu0 }
 0x1cf   :  { %v888_v27 = vadd.f32 %v2464_v16, %v864_v21  ;;  %v870_v29 = vmul.f32 %v2457_v8, %v843_v25  ;;  %v845_v30 = vpop.f32.mrb[7].mxu0 }
 0x1d0   :  { %v889_v31 = vadd.f32 %v2464_v16, %v865_v24  ;;  %1245 = vrot.lane.b32.xlu0 %v2489_v51, %s2139_s16  ;;  %1291 = vrot.lane.b32.xlu1 %v2489_v51, %s2140_s17  ;;  %v871_v33 = vmul.f32 %v2457_v8, %v845_v30 }
 0x1d1   :  { %vm900_vm10 = vcmp.ge.f32.partialorder %v888_v27, 0.0  ;;  %v912_v34 = vmul.f32 0.1, %v888_v27  ;;  %v894_v9 = vadd.f32 %v2472_v23, %v870_v29 }
 0x1d2   :  { %vm901_vm11 = vcmp.ge.f32.partialorder %v889_v31, 0.0  ;;  %v913_v36 = vmul.f32 0.1, %v889_v31  ;;  %v895_v37 = vadd.f32 %v2472_v23, %v871_v33 }
 0x1d3   :  { %v924_v6 = vsel %vm900_vm10, %v888_v27, %v912_v34  ;;  %vm906_vm12 = vcmp.ge.f32.partialorder %v894_v9, 0.0  ;;  %v918_v38 = vmul.f32 0.1, %v894_v9 }
 0x1d4   :  { %v968_v16 = vmul.f32 %v2450_v3, %v924_v6  ;;  %v925_v39 = vsel %vm901_vm11, %v889_v31, %v913_v36  ;;  %vm907_vm13 = vcmp.ge.f32.partialorder %v895_v37, 0.0  ;;  %v919_v40 = vmul.f32 0.1, %v895_v37  ;;  %1295 = vrot.lane.b32.xlu0 %v978_v19, %s2140_s17  ;;  %1341 = vrot.lane.b32.xlu1 %v978_v19, %s2141_s18 }
 0x1d5   :  { %v969_v8 = vmul.f32 %v2455_v7, %v925_v39  ;;  %v930_v4 = vsel %vm906_vm12, %v894_v9, %v918_v38 }
 0x1d6   :  { %v974_v41 = vmul.f32 %v2450_v3, %v930_v4  ;;  %v931_v5 = vsel %vm907_vm13, %v895_v37, %v919_v40  ;;  %v2567_v3 = vld [vmem:[%s2887_s5 + $0x4] ss:$8 sps:$4 sm:$0xff]  }
 0x1d7   :  { %v975_v23 = vmul.f32 %v2455_v7, %v931_v5  ;;  %2010 = vmatprep.mubr.msk.bf16.mxu1 %vm715_vm0, %v2567_v3  ;;  %2012 = vmatprep.mubr.msk.bf16.mxu0 %vm715_vm0, %v2567_v3  ;;  %v2617_v7 = vpop.permute.xlu0 %1027 }
 0x1d8   :  { %v2540_v26 = vpack.c.bf16 %v974_v41, %v968_v16  ;;  %1337 = vrot.lane.b32.xlu0 %v2489_v51, %s2141_s18  ;;  %1017 = vrot.lane.b32.xlu1 %v2493_v55, %s2134_s27  ;;  %v1658_v51 = vld [vmem:[%s2889_s7] sm:$0xff] }
 0x1d9   :  { %v2546_v42 = vpack.c.bf16 %v975_v23, %v969_v8 }
 0x1db   :  { %v2628_v45 = vpop.permute.xlu0 %1073 }
 0x1dc   :  { %1063 = vrot.lane.b32.xlu0 %v2493_v55, %s2135_s12  ;;  %1109 = vrot.lane.b32.xlu1 %v2493_v55, %s2136_s13 }
 0x1df   :  { %v2638_v35 = vpop.permute.xlu0 %1119 }
 0x1e0   :  { %1211 = vrot.lane.b32.xlu0 %v2142_v14, %s2138_s15  ;;  %1201 = vrot.lane.b32.xlu1 %v2493_v55, %s2138_s15 }
 0x1e3   :  { %v2648_v49 = vpop.permute.xlu0 %1165 }
 0x1e4   :  { %1155 = vrot.lane.b32.xlu0 %v2493_v55, %s2137_s14  ;;  %1293 = vrot.lane.b32.xlu1 %v2493_v55, %s2140_s17 }
 0x1e8   :  { %1257 = vrot.lane.b32.xlu0 %v2142_v14, %s2139_s16  ;;  %1021 = vrot.lane.b32.xlu1 %v2505_v1, %s2134_s27 }
 0x1ec   :  { %1247 = vrot.lane.b32.xlu0 %v2493_v55, %s2139_s16  ;;  %1067 = vrot.lane.b32.xlu1 %v2505_v1, %s2135_s12 }
 0x1f0   :  { %1303 = vrot.lane.b32.xlu0 %v2142_v14, %s2140_s17  ;;  %1113 = vrot.lane.b32.xlu1 %v2505_v1, %s2136_s13 }
 0x1f4   :  { %1339 = vrot.lane.b32.xlu0 %v2493_v55, %s2141_s18  ;;  %1159 = vrot.lane.b32.xlu1 %v2505_v1, %s2137_s14 }
 0x1f8   :  { %1205 = vrot.lane.b32.xlu1 %v2505_v1, %s2138_s15  ;;  %1023 = vrot.lane.b32.xlu0 %v2540_v26, %s2134_s27 }
 0x1fc   :  { %1251 = vrot.lane.b32.xlu1 %v2505_v1, %s2139_s16  ;;  %1069 = vrot.lane.b32.xlu0 %v2540_v26, %s2135_s12 }
 0x200   :  { %1297 = vrot.lane.b32.xlu1 %v2505_v1, %s2140_s17  ;;  %1115 = vrot.lane.b32.xlu0 %v2540_v26, %s2136_s13 }
 0x204   :  { %1343 = vrot.lane.b32.xlu1 %v2505_v1, %s2141_s18  ;;  %1161 = vrot.lane.b32.xlu0 %v2540_v26, %s2137_s14 }
 0x208   :  { %1207 = vrot.lane.b32.xlu0 %v2540_v26, %s2138_s15  ;;  %1025 = vrot.lane.b32.xlu1 %v2546_v42, %s2134_s27 }
 0x20c   :  { %1253 = vrot.lane.b32.xlu0 %v2540_v26, %s2139_s16  ;;  %1071 = vrot.lane.b32.xlu1 %v2546_v42, %s2135_s12 }
 0x210   :  { %1299 = vrot.lane.b32.xlu0 %v2540_v26, %s2140_s17  ;;  %1117 = vrot.lane.b32.xlu1 %v2546_v42, %s2136_s13 }
 0x214   :  { %1345 = vrot.lane.b32.xlu0 %v2540_v26, %s2141_s18  ;;  %1163 = vrot.lane.b32.xlu1 %v2546_v42, %s2137_s14 }
 0x218   :  { %1349 = vrot.lane.b32.xlu0 %v2142_v14, %s2141_s18  ;;  %1209 = vrot.lane.b32.xlu1 %v2546_v42, %s2138_s15  ;;  %v1659_v14 = vld [vmem:[%s2889_s7 + $0x8] sm:$0xff] }
 0x21c   :  { %1621 = vperm.xlu0 %2055, %v1611_v43   ;;  %1255 = vrot.lane.b32.xlu1 %v2546_v42, %s2139_s16 }
 0x220   :  { %1631 = vperm.xlu0 %2055, %v1613_v46   ;;  %1301 = vrot.lane.b32.xlu1 %v2546_v42, %s2140_s17 }
 0x224   :  { %1669 = vperm.xlu0 %2055, %v1659_v14   ;;  %1347 = vrot.lane.b32.xlu1 %v2546_v42, %s2141_s18 }
 0x227   :  { %v1016_v44 = vpop.permute.xlu1 %1015 }
 0x228   :  { %1679 = vperm.xlu0 %2055, %v1661_v47   ;;  %1616 = vperm.xlu1 %2056, %v1610_v48  }
 0x22c   :  { %1626 = vperm.xlu1 %2056, %v1612_v50  }
 0x22e   :  { %v2656_v52 = vpop.permute.xlu0 %1019  ;;  %v2658_v53 = vpop.permute.xlu1 %1065 }
 0x230   :  { %1664 = vperm.xlu1 %2056, %v1658_v51  }
 0x232   :  { %v1062_v55 = vpop.permute.xlu0 %1061  ;;  %v1108_v56 = vpop.permute.xlu1 %1107 }
 0x234   :  { %1674 = vperm.xlu1 %2056, %v1660_v54   ;;  %v2714_v54 = vld [vmem:[%s2887_s5 + $0x14] ss:$8 sps:$4 sm:$0xff]  }
 0x236   :  { %v2663_v57 = vpop.permute.xlu0 %1111  ;;  %v2665_v58 = vpop.permute.xlu1 %1157 }
 0x23a   :  { %v1154_v59 = vpop.permute.xlu0 %1153  ;;  %v1200_v60 = vpop.permute.xlu1 %1199 }
 0x23e   :  { %v2667_v61 = vpop.permute.xlu0 %1203  ;;  %v2669_v62 = vpop.permute.xlu1 %1249 }
 0x242   :  { %v1246_v11 = vpop.permute.xlu0 %1245  ;;  %v1292_v13 = vpop.permute.xlu1 %1291 }
 0x246   :  { %v2671_v15 = vpop.permute.xlu0 %1295  ;;  %v2673_v17 = vpop.permute.xlu1 %1341 }
 0x24a   :  { %v1338_v18 = vpop.permute.xlu0 %1337  ;;  %v1018_v19 = vpop.permute.xlu1 %1017 }
 0x24b   :  { %v1029_v1 = vsel %vm141_vm1, %v1016_v44, %v1018_v19  ;;  %v1030_v20 = vsel %vm141_vm1, %v1018_v19, %v2656_v52  ;;  %v2708_v44 = vld [vmem:[%s2887_s5] ss:$8 sps:$4 sm:$0xff]  }
 0x24c   :  { %1453 = vmatprep.subr.bf16.mxu1 %v1030_v20 }
 0x24d   :  { %1454 = vmatpush1.bf16.msra.mxu1 %v1029_v1 }
 0x24e   :  { %v1064_v21 = vpop.permute.xlu0 %1063  ;;  %v1110_v22 = vpop.permute.xlu1 %1109 }
 0x24f   :  { %v1075_v24 = vsel %vm211_vm2, %v1062_v55, %v1064_v21  ;;  %v1076_v25 = vsel %vm211_vm2, %v1064_v21, %v2658_v53  ;;  %v1122_v27 = vsel %vm281_vm3, %v1110_v22, %v2663_v57  ;;  %v1121_v31 = vsel %vm281_vm3, %v1108_v56, %v1110_v22 }
 0x250   :  { %1455 = vmatprep.subr.bf16.mxu1 %v1076_v25 }
 0x251   :  { %1456 = vmatpush1.bf16.msra.mxu1 %v1075_v24 }
 0x252   :  { %v2683_v29 = vpop.permute.xlu0 %1211  ;;  %v1202_v30 = vpop.permute.xlu1 %1201  ;;  %1457 = vmatprep.subr.bf16.mxu1 %v1122_v27 }
 0x253   :  { %v1214_v37 = vsel %vm421_vm5, %v1202_v30, %v2667_v61  ;;  %v1213_v16 = vsel %vm421_vm5, %v1200_v60, %v1202_v30 }
 0x255   :  { %1458 = vmatpush1.bf16.msra.mxu1 %v1121_v31 }
 0x256   :  { %v1156_v33 = vpop.permute.xlu0 %1155  ;;  %v1294_v34 = vpop.permute.xlu1 %1293 }
 0x257   :  { %v1167_v9 = vsel %vm351_vm4, %v1154_v59, %v1156_v33  ;;  %v1168_v36 = vsel %vm351_vm4, %v1156_v33, %v2665_v58  ;;  %v1306_v41 = vsel %vm561_vm7, %v1294_v34, %v2671_v15  ;;  %v1305_v43 = vsel %vm561_vm7, %v1292_v13, %v1294_v34 }
 0x258   :  { %1459 = vmatprep.subr.bf16.mxu1 %v1168_v36 }
 0x259   :  { %1460 = vmatpush1.bf16.msra.mxu1 %v1167_v9 }
 0x25a   :  { %v2691_v6 = vpop.permute.xlu0 %1257  ;;  %v1022_v38 = vpop.permute.xlu1 %1021  ;;  %1461 = vmatprep.subr.bf16.mxu1 %v1214_v37 }
 0x25b   :  { %v1031_v56 = vsel %vm141_vm1, %v2656_v52, %v1022_v38  ;;  %v2729_v52 = vld [vmem:[%s2887_s5 + $0x10] ss:$8 sps:$4 sm:$0xff]  }
 0x25d   :  { %1462 = vmatpush1.bf16.msra.mxu1 %v1213_v16 }
 0x25e   :  { %v1248_v39 = vpop.permute.xlu0 %1247  ;;  %v1068_v40 = vpop.permute.xlu1 %1067 }
 0x25f   :  { %v1259_v8 = vsel %vm491_vm6, %v1246_v11, %v1248_v39  ;;  %v1260_v4 = vsel %vm491_vm6, %v1248_v39, %v2669_v62  ;;  %v1077_v11 = vsel %vm211_vm2, %v2658_v53, %v1068_v40 }
 0x260   :  { %1463 = vmatprep.subr.bf16.mxu1 %v1260_v4 }
 0x261   :  { %1464 = vmatpush1.bf16.msra.mxu1 %v1259_v8 }
 0x262   :  { %v2699_v5 = vpop.permute.xlu0 %1303  ;;  %v1114_v23 = vpop.permute.xlu1 %1113  ;;  %1465 = vmatprep.subr.bf16.mxu1 %v1306_v41 }
 0x263   :  { %v1123_v19 = vsel %vm281_vm3, %v2663_v57, %v1114_v23 }
 0x265   :  { %1466 = vmatpush1.bf16.msra.mxu1 %v1305_v43 }
 0x266   :  { %v1340_v46 = vpop.permute.xlu0 %1339  ;;  %v1160_v14 = vpop.permute.xlu1 %1159 }
 0x267   :  { %v1351_v47 = vsel %vm631_vm8, %v1338_v18, %v1340_v46  ;;  %v1352_v48 = vsel %vm631_vm8, %v1340_v46, %v2673_v17  ;;  %v1169_v21 = vsel %vm351_vm4, %v2665_v58, %v1160_v14 }
 0x268   :  { %1467 = vmatprep.subr.bf16.mxu1 %v1352_v48 }
 0x269   :  { %1468 = vmatpush1.bf16.msra.mxu1 %v1351_v47 }
 0x26a   :  { %v1206_v50 = vpop.permute.xlu1 %1205  ;;  %v1024_v51 = vpop.permute.xlu0 %1023  ;;  %1557 = vmatprep.subr.bf16.mxu1 %v2546_v42 }
 0x26b   :  { %v1032_v55 = vsel %vm141_vm1, %v1022_v38, %v1024_v51 }
 0x26c   :  { %1484 = vmatmul.mubr.bf16.vlgmr.msra.gmra.mrb[4].mxu1 %v2708_v44  ;;  %1506 = vmatprep.subr.bf16.mxu0 %v1032_v55 }
 0x26d   :  { %1507 = vmatpush1.bf16.msra.mxu0 %v1031_v56  ;;  %1558 = vmatpush1.bf16.msra.mxu1 %v2540_v26 }
 0x26e   :  { %v1252_v59 = vpop.permute.xlu1 %1251  ;;  %v1070_v60 = vpop.permute.xlu0 %1069  ;;  %2011 = vmatprep.mubr.msk.bf16.mxu1 %vm715_vm0, %v2714_v54 }
 0x26f   :  { %v1078_v42 = vsel %vm211_vm2, %v1068_v40, %v1070_v60  ;;  %v1261_v9 = vsel %vm491_vm6, %v2669_v62, %v1252_v59 }
 0x270   :  { %1508 = vmatprep.subr.bf16.mxu0 %v1078_v42 }
 0x271   :  { %1509 = vmatpush1.bf16.msra.mxu0 %v1077_v11 }
 0x272   :  { %v1298_v13 = vpop.permute.xlu1 %1297  ;;  %v1116_v18 = vpop.permute.xlu0 %1115 }
 0x273   :  { %v1124_v26 = vsel %vm281_vm3, %v1114_v23, %v1116_v18  ;;  %v1307_v16 = vsel %vm561_vm7, %v2671_v15, %v1298_v13 }
 0x274   :  { %1494 = vmatmul.mubr.bf16.gmra.mrb[8].mxu1 %v2729_v52  ;;  %1510 = vmatprep.subr.bf16.mxu0 %v1124_v26 }
 0x275   :  { %1511 = vmatpush1.bf16.msra.mxu0 %v1123_v19  ;;  %2014 = vmatprep.mubr.msk.bf16.mxu1 %vm715_vm0, %v2567_v3  ;;  %v1215_v3 = vsel %vm421_vm5, %v2667_v61, %v1206_v50 }
 0x276   :  { %v1344_v53 = vpop.permute.xlu1 %1343  ;;  %v1162_v1 = vpop.permute.xlu0 %1161 }
 0x277   :  { %v1170_v20 = vsel %vm351_vm4, %v1160_v14, %v1162_v1  ;;  %v1353_v4 = vsel %vm631_vm8, %v2673_v17, %v1344_v53 }
 0x278   :  { %1512 = vmatprep.subr.bf16.mxu0 %v1170_v20 }
 0x279   :  { %1513 = vmatpush1.bf16.msra.mxu0 %v1169_v21 }
 0x27a   :  { %v1208_v22 = vpop.permute.xlu0 %1207  ;;  %v1026_v24 = vpop.permute.xlu1 %1025 }
 0x27b   :  { %v1033_v57 = vsel %vm141_vm1, %v1024_v51, %v1026_v24  ;;  %v1216_v25 = vsel %vm421_vm5, %v1206_v50, %v1208_v22  ;;  %v1034_v27 = vsel %vm141_vm1, %v1026_v24, %v2617_v7 }
 0x27c   :  { %1514 = vmatprep.subr.bf16.mxu0 %v1216_v25  ;;  %1559 = vmatprep.subr.bf16.mxu1 %v1034_v27 }
 0x27d   :  { %1515 = vmatpush1.bf16.msra.mxu0 %v1215_v3  ;;  %1560 = vmatpush1.bf16.msra.mxu1 %v1033_v57 }
 0x27e   :  { %v1254_v30 = vpop.permute.xlu0 %1253  ;;  %v1072_v58 = vpop.permute.xlu1 %1071 }
 0x27f   :  { %v1079_v31 = vsel %vm211_vm2, %v1070_v60, %v1072_v58  ;;  %v1262_v33 = vsel %vm491_vm6, %v1252_v59, %v1254_v30  ;;  %v1080_v34 = vsel %vm211_vm2, %v1072_v58, %v2628_v45  ;;  %v2794_v59 = vld [vmem:[%s2890_s8] sm:$0x3f]  ;;  %s2143_s8 = smov [#allocation7]  }
 0x280   :  { %1516 = vmatprep.subr.bf16.mxu0 %v1262_v33  ;;  %1561 = vmatprep.subr.bf16.mxu1 %v1080_v34  ;;  %v1783_v26 = vrot.slane %v2794_v59, %v936_v10  ;;  %v1787_v20 = vrot.slane %v2794_v59, %v940_v12  ;;  %s1927_s30 = sshll.u32 %s2143_s8, 4  ;;  %s1928_s30 = int_to_ptr.vmem [resolvable:$true] %s1927_s30 }
 0x281   :  { %1517 = vmatpush1.bf16.msra.mxu0 %v1261_v9  ;;  %1562 = vmatpush1.bf16.msra.mxu1 %v1079_v31  ;;  %s2105_s2 = scalar_lea.vmem %s1928_s30, 1792  ;;  %p2110_p9 = scmp.lt.s32.totalorder %s1928_s30, %s1928_s30 }
 0x282   :  { %v1300_v7 = vpop.permute.xlu0 %1299  ;;  %v1118_v61 = vpop.permute.xlu1 %1117  ;;  %p2106_p8 = scmp.ne.s32.totalorder %s1928_s30, %s2105_s2  ;;  %p2111_p10 = scmp.lt.s32.totalorder %s2105_s2, %s2105_s2 }
 0x283   :  { %v1125_v36 = vsel %vm281_vm3, %v1116_v18, %v1118_v61  ;;  %v1308_v37 = vsel %vm561_vm7, %v1298_v13, %v1300_v7  ;;  %v1126_v38 = vsel %vm281_vm3, %v1118_v61, %v2638_v35 }
 0x284   :  { %1518 = vmatprep.subr.bf16.mxu0 %v1308_v37  ;;  %1563 = vmatprep.subr.bf16.mxu1 %v1126_v38  ;;  %p2112_p11 = por %p2111_p10, %p2110_p9 }
 0x285   :  { %1519 = vmatpush1.bf16.msra.mxu0 %v1307_v16  ;;  %1564 = vmatpush1.bf16.msra.mxu1 %v1125_v36 }
 0x286   :  { %v1346_v45 = vpop.permute.xlu0 %1345  ;;  %v1164_v62 = vpop.permute.xlu1 %1163  ;;  %p2113_p12 = pnand %p2112_p11, %p2106_p8 }
 0x287   :  { %v1171_v39 = vsel %vm351_vm4, %v1162_v1, %v1164_v62  ;;  %v1354_v40 = vsel %vm631_vm8, %v1344_v53, %v1346_v45  ;;  %v1172_v8 = vsel %vm351_vm4, %v1164_v62, %v2648_v49 }
 0x288   :  { %1520 = vmatprep.subr.bf16.mxu0 %v1354_v40  ;;  %1565 = vmatprep.subr.bf16.mxu1 %v1172_v8 }
 0x289   :  { %1521 = vmatpush1.bf16.msra.mxu0 %v1353_v4  ;;  %1566 = vmatpush1.bf16.msra.mxu1 %v1171_v39 }
 0x28a   :  { %v1210_v35 = vpop.permute.xlu1 %1209  ;;  %v1350_v14 = vpop.permute.xlu0 %1349 }
 0x28b   :  { %v1217_v15 = vsel %vm421_vm5, %v1208_v22, %v1210_v35  ;;  %v1218_v41 = vsel %vm421_vm5, %v1210_v35, %v2683_v29 }
 0x28c   :  { %1537 = vmatmul.mubr.bf16.vlgmr.msra.gmra.mrb[8].mxu0 %v2708_v44  ;;  %1567 = vmatprep.subr.bf16.mxu1 %v1218_v41 }
 0x28d   :  { %1568 = vmatpush1.bf16.msra.mxu1 %v1217_v15  ;;  %2013 = vmatprep.mubr.msk.bf16.mxu0 %vm715_vm0, %v2714_v54 }
 0x28e   :  { %v1256_v49 = vpop.permute.xlu1 %1255 }
 0x28f   :  { %v1263_v17 = vsel %vm491_vm6, %v1254_v30, %v1256_v49  ;;  %v1264_v23 = vsel %vm491_vm6, %v1256_v49, %v2691_v6 }
 0x290   :  { %1569 = vmatprep.subr.bf16.mxu1 %v1264_v23 }
 0x291   :  { %1570 = vmatpush1.bf16.msra.mxu1 %v1263_v17 }
 0x292   :  { %v1302_v43 = vpop.permute.xlu1 %1301 }
 0x293   :  { %v1309_v46 = vsel %vm561_vm7, %v1300_v7, %v1302_v43  ;;  %v1310_v29 = vsel %vm561_vm7, %v1302_v43, %v2699_v5 }
 0x294   :  { %1547 = vmatmul.mubr.bf16.gmra.mrb[12].mxu0 %v2729_v52  ;;  %1571 = vmatprep.subr.bf16.mxu1 %v1310_v29 }
 0x295   :  { %1572 = vmatpush1.bf16.msra.mxu1 %v1309_v46 }
 0x296   :  { %v1348_v47 = vpop.permute.xlu1 %1347 }
 0x297   :  { %v1355_v48 = vsel %vm631_vm8, %v1346_v45, %v1348_v47  ;;  %v1356_v50 = vsel %vm631_vm8, %v1348_v47, %v1350_v14 }
 0x298   :  { %1573 = vmatprep.subr.bf16.mxu1 %v1356_v50 }
 0x299   :  { %1574 = vmatpush1.bf16.msra.mxu1 %v1355_v48 }
 0x29b   :  { %v2785_v5 = vpop.permute.xlu0 %1621 }
 0x29c   :  { %1590 = vmatmul.mubr.bf16.vlgmr.msra.gmra.mrb[12].mxu1 %v2708_v44 }
 0x29d   :  { %2015 = vmatprep.mubr.msk.bf16.mxu1 %vm715_vm0, %v2714_v54 }
 0x29f   :  { %v2789_v55 = vpop.permute.xlu0 %1631 }
 0x2a3   :  { %v2805_v19 = vpop.permute.xlu0 %1669 }
 0x2a4   :  { %1600 = vmatmul.mubr.bf16.gmra.mrb[16].mxu1 %v2729_v52 }
 0x2a7   :  { %v2783_v6 = vpop.permute.xlu1 %1616  ;;  %v2820_v40 = vpop.permute.xlu0 %1679 }
 0x2ab   :  { %v2787_v51 = vpop.permute.xlu1 %1626 }
 0x2af   :  { %v2797_v54 = vpop.permute.xlu1 %1664 }
 0x2b3   :  { %v2815_v9 = vpop.permute.xlu1 %1674 }
 0x33f   :  { %v1485_v56 = vpop.f32.mrb[4].mxu1 }
 0x340   :  { %v1634_v44 = vmul.f32 %v2783_v6, %v1485_v56  ;;  %v1487_v60 = vpop.f32.mrb[5].mxu1 }
 0x341   :  { %v1635_v42 = vmul.f32 %v2783_v6, %v1487_v60  ;;  %v1489_v11 = vpop.f32.mrb[6].mxu1 }
 0x342   :  { %v1682_v52 = vadd.f32 %v2797_v54, %v1634_v44  ;;  %v1640_v13 = vmul.f32 %v2785_v5, %v1489_v11  ;;  %v1491_v18 = vpop.f32.mrb[7].mxu1 }
 0x343   :  { %v1683_v53 = vadd.f32 %v2797_v54, %v1635_v42  ;;  %v1641_v1 = vmul.f32 %v2785_v5, %v1491_v18 }
 0x344   :  { %vm1706_vm0 = vcmp.ge.f32.partialorder %v1682_v52, 0.0  ;;  %v1730_v21 = vmul.f32 0.1, %v1682_v52  ;;  %v1688_v22 = vadd.f32 %v2805_v19, %v1640_v13 }
 0x345   :  { %vm1707_vm1 = vcmp.ge.f32.partialorder %v1683_v53, 0.0  ;;  %v1731_v24 = vmul.f32 0.1, %v1683_v53  ;;  %v1689_v57 = vadd.f32 %v2805_v19, %v1641_v1 }
 0x346   :  { %v1754_v25 = vsel %vm1706_vm0, %v1682_v52, %v1730_v21  ;;  %vm1712_vm2 = vcmp.ge.f32.partialorder %v1688_v22, 0.0  ;;  %v1736_v10 = vmul.f32 0.1, %v1688_v22 }
 0x347   :  { %v1810_v27 = vmul.f32 %v1783_v26, %v1754_v25  ;;  %v1755_v3 = vsel %vm1707_vm1, %v1683_v53, %v1731_v24  ;;  %vm1713_vm3 = vcmp.ge.f32.partialorder %v1689_v57, 0.0  ;;  %v1737_v30 = vmul.f32 0.1, %v1689_v57  ;;  %v1495_v58 = vpop.f32.mrb[8].mxu1 }
 0x348   :  { %v1811_v31 = vmul.f32 %v1787_v20, %v1755_v3  ;;  %v1760_v33 = vsel %vm1712_vm2, %v1688_v22, %v1736_v10  ;;  %v1646_v12 = vmul.f32 %v2787_v51, %v1495_v58  ;;  %v1497_v34 = vpop.f32.mrb[9].mxu1 }
 0x349   :  { %v1816_v7 = vmul.f32 %v1783_v26, %v1760_v33  ;;  %v1761_v61 = vsel %vm1713_vm3, %v1689_v57, %v1737_v30  ;;  %v1647_v36 = vmul.f32 %v2787_v51, %v1497_v34  ;;  %v1499_v37 = vpop.f32.mrb[10].mxu1  ;;  %v1795_v57 = vrot.slane %v2794_v59, %v948_v32 }
 0x34a   :  { %v2028_v38 = vpack.c.bf16 %v1811_v31, %v1810_v27  ;;  %v1817_v16 = vmul.f32 %v1787_v20, %v1761_v61  ;;  %v1694_v45 = vadd.f32 %v2815_v9, %v1646_v12  ;;  %v1652_v62 = vmul.f32 %v2789_v55, %v1499_v37  ;;  %v1501_v39 = vpop.f32.mrb[11].mxu1 }
 0x34b   :  { %v1695_v8 = vadd.f32 %v2815_v9, %v1647_v36  ;;  %v1653_v4 = vmul.f32 %v2789_v55, %v1501_v39 }
 0x34c   :  { %1906 = vst [vmem:[#allocation7] sm:$0xff] %v2028_v38  ;;  %v2031_v35 = vpack.c.bf16 %v1817_v16, %v1816_v7  ;;  %vm1718_vm4 = vcmp.ge.f32.partialorder %v1694_v45, 0.0  ;;  %v1742_v15 = vmul.f32 0.1, %v1694_v45  ;;  %v1700_v41 = vadd.f32 %v2820_v40, %v1652_v62 }
 0x34d   :  { %vm1719_vm5 = vcmp.ge.f32.partialorder %v1695_v8, 0.0  ;;  %v1743_v49 = vmul.f32 0.1, %v1695_v8  ;;  %v1701_v17 = vadd.f32 %v2820_v40, %v1653_v4 }
 0x34e   :  { %1909 = vst [vmem:[#allocation7 + $0x1c] sm:$0xff] %v2031_v35  ;;  %v1766_v23 = vsel %vm1718_vm4, %v1694_v45, %v1742_v15  ;;  %vm1724_vm6 = vcmp.ge.f32.partialorder %v1700_v41, 0.0  ;;  %v1748_v43 = vmul.f32 0.1, %v1700_v41 }
 0x34f   :  { %v1822_v46 = vmul.f32 %v1783_v26, %v1766_v23  ;;  %v1767_v29 = vsel %vm1719_vm5, %v1695_v8, %v1743_v49  ;;  %vm1725_vm7 = vcmp.ge.f32.partialorder %v1701_v17, 0.0  ;;  %v1749_v14 = vmul.f32 0.1, %v1701_v17 }
 0x350   :  { %v1823_v47 = vmul.f32 %v1787_v20, %v1767_v29  ;;  %v1772_v48 = vsel %vm1724_vm6, %v1700_v41, %v1748_v43 }
 0x351   :  { %v1828_v50 = vmul.f32 %v1783_v26, %v1772_v48  ;;  %v1773_v56 = vsel %vm1725_vm7, %v1701_v17, %v1749_v14  ;;  %v1791_v26 = vrot.slane %v2794_v59, %v944_v28 }
 0x352   :  { %v2034_v44 = vpack.c.bf16 %v1823_v47, %v1822_v46  ;;  %v1829_v60 = vmul.f32 %v1787_v20, %v1773_v56 }
 0x354   :  { %1912 = vst [vmem:[#allocation7 + $0x38] sm:$0xff] %v2034_v44  ;;  %v2037_v42 = vpack.c.bf16 %v1829_v60, %v1828_v50 }
 0x356   :  { %1915 = vst [vmem:[#allocation7 + $0x54] sm:$0xff] %v2037_v42 }
 0x35f   :  { %v1538_v11 = vpop.f32.mrb[8].mxu0 }
 0x360   :  { %v1636_v52 = vmul.f32 %v2783_v6, %v1538_v11  ;;  %v1540_v13 = vpop.f32.mrb[9].mxu0 }
 0x361   :  { %v1637_v18 = vmul.f32 %v2783_v6, %v1540_v13  ;;  %v1542_v53 = vpop.f32.mrb[10].mxu0 }
 0x362   :  { %v1684_v1 = vadd.f32 %v2797_v54, %v1636_v52  ;;  %v1642_v21 = vmul.f32 %v2785_v5, %v1542_v53  ;;  %v1544_v22 = vpop.f32.mrb[11].mxu0 }
 0x363   :  { %v1685_v20 = vadd.f32 %v2797_v54, %v1637_v18  ;;  %v1643_v24 = vmul.f32 %v2785_v5, %v1544_v22 }
 0x364   :  { %vm1708_vm8 = vcmp.ge.f32.partialorder %v1684_v1, 0.0  ;;  %v1732_v25 = vmul.f32 0.1, %v1684_v1  ;;  %v1690_v10 = vadd.f32 %v2805_v19, %v1642_v21 }
 0x365   :  { %vm1709_vm14 = vcmp.ge.f32.partialorder %v1685_v20, 0.0  ;;  %v1733_v27 = vmul.f32 0.1, %v1685_v20  ;;  %v1691_v3 = vadd.f32 %v2805_v19, %v1643_v24  ;;  %v1799_v24 = vrot.slane %v2794_v59, %v952_v0 }
 0x366   :  { %v1756_v30 = vsel %vm1708_vm8, %v1684_v1, %v1732_v25  ;;  %vm1714_vm15 = vcmp.ge.f32.partialorder %v1690_v10, 0.0  ;;  %v1738_v58 = vmul.f32 0.1, %v1690_v10  ;;  %v1803_v25 = vrot.slane %v2794_v59, %v956_v2 }
 0x367   :  { %v1812_v28 = vmul.f32 %v1791_v26, %v1756_v30  ;;  %v1757_v31 = vsel %vm1709_vm14, %v1685_v20, %v1733_v27  ;;  %vm1715_vm9 = vcmp.ge.f32.partialorder %v1691_v3, 0.0  ;;  %v1739_v33 = vmul.f32 0.1, %v1691_v3  ;;  %v1548_v12 = vpop.f32.mrb[12].mxu0 }
 0x368   :  { %v1813_v34 = vmul.f32 %v1795_v57, %v1757_v31  ;;  %v1762_v7 = vsel %vm1714_vm15, %v1690_v10, %v1738_v58  ;;  %v1648_v32 = vmul.f32 %v2787_v51, %v1548_v12  ;;  %v1550_v61 = vpop.f32.mrb[13].mxu0 }
 0x369   :  { %v1818_v36 = vmul.f32 %v1791_v26, %v1762_v7  ;;  %v1763_v37 = vsel %vm1715_vm9, %v1691_v3, %v1739_v33  ;;  %v1649_v38 = vmul.f32 %v2787_v51, %v1550_v61  ;;  %v1552_v16 = vpop.f32.mrb[14].mxu0 }
 0x36a   :  { %v2029_v45 = vpack.c.bf16 %v1813_v34, %v1812_v28  ;;  %v1819_v62 = vmul.f32 %v1795_v57, %v1763_v37  ;;  %v1696_v39 = vadd.f32 %v2815_v9, %v1648_v32  ;;  %v1654_v8 = vmul.f32 %v2789_v55, %v1552_v16  ;;  %v1554_v4 = vpop.f32.mrb[15].mxu0 }
 0x36b   :  { %v1697_v35 = vadd.f32 %v2815_v9, %v1649_v38  ;;  %v1655_v15 = vmul.f32 %v2789_v55, %v1554_v4 }
 0x36c   :  { %1907 = vst [vmem:[#allocation7 + $0x8] sm:$0xff] %v2029_v45  ;;  %v2032_v41 = vpack.c.bf16 %v1819_v62, %v1818_v36  ;;  %vm1720_vm10 = vcmp.ge.f32.partialorder %v1696_v39, 0.0  ;;  %v1744_v49 = vmul.f32 0.1, %v1696_v39  ;;  %v1702_v17 = vadd.f32 %v2820_v40, %v1654_v8 }
 0x36d   :  { %vm1721_vm11 = vcmp.ge.f32.partialorder %v1697_v35, 0.0  ;;  %v1745_v23 = vmul.f32 0.1, %v1697_v35  ;;  %v1703_v43 = vadd.f32 %v2820_v40, %v1655_v15 }
 0x36e   :  { %1910 = vst [vmem:[#allocation7 + $0x24] sm:$0xff] %v2032_v41  ;;  %v1768_v46 = vsel %vm1720_vm10, %v1696_v39, %v1744_v49  ;;  %vm1726_vm12 = vcmp.ge.f32.partialorder %v1702_v17, 0.0  ;;  %v1750_v29 = vmul.f32 0.1, %v1702_v17 }
 0x36f   :  { %v1824_v14 = vmul.f32 %v1791_v26, %v1768_v46  ;;  %v1769_v47 = vsel %vm1721_vm11, %v1697_v35, %v1745_v23  ;;  %vm1727_vm13 = vcmp.ge.f32.partialorder %v1703_v43, 0.0  ;;  %v1751_v48 = vmul.f32 0.1, %v1703_v43  ;;  %v1591_v50 = vpop.f32.mrb[12].mxu1 }
 0x370   :  { %v1825_v56 = vmul.f32 %v1795_v57, %v1769_v47  ;;  %v1774_v44 = vsel %vm1726_vm12, %v1702_v17, %v1750_v29  ;;  %v1638_v60 = vmul.f32 %v2783_v6, %v1591_v50  ;;  %v1593_v42 = vpop.f32.mrb[13].mxu1 }
 0x371   :  { %v1830_v11 = vmul.f32 %v1791_v26, %v1774_v44  ;;  %v1775_v52 = vsel %vm1727_vm13, %v1703_v43, %v1751_v48  ;;  %v1639_v13 = vmul.f32 %v2783_v6, %v1593_v42  ;;  %v1595_v18 = vpop.f32.mrb[14].mxu1 }
 0x372   :  { %v2035_v53 = vpack.c.bf16 %v1825_v56, %v1824_v14  ;;  %v1831_v1 = vmul.f32 %v1795_v57, %v1775_v52  ;;  %v1686_v21 = vadd.f32 %v2797_v54, %v1638_v60  ;;  %v1644_v22 = vmul.f32 %v2785_v5, %v1595_v18  ;;  %v1597_v20 = vpop.f32.mrb[15].mxu1 }
 0x373   :  { %v1687_v26 = vadd.f32 %v2797_v54, %v1639_v13  ;;  %v1645_v6 = vmul.f32 %v2785_v5, %v1597_v20 }
 0x374   :  { %1913 = vst [vmem:[#allocation7 + $0x40] sm:$0xff] %v2035_v53  ;;  %v2038_v10 = vpack.c.bf16 %v1831_v1, %v1830_v11  ;;  %vm1710_vm0 = vcmp.ge.f32.partialorder %v1686_v21, 0.0  ;;  %v1734_v57 = vmul.f32 0.1, %v1686_v21  ;;  %v1692_v27 = vadd.f32 %v2805_v19, %v1644_v22 }
 0x375   :  { %vm1711_vm1 = vcmp.ge.f32.partialorder %v1687_v26, 0.0  ;;  %v1735_v3 = vmul.f32 0.1, %v1687_v26  ;;  %v1693_v30 = vadd.f32 %v2805_v19, %v1645_v6 }
 0x376   :  { %1916 = vst [vmem:[#allocation7 + $0x5c] sm:$0xff] %v2038_v10  ;;  %v1758_v0 = vsel %vm1710_vm0, %v1686_v21, %v1734_v57  ;;  %vm1716_vm2 = vcmp.ge.f32.partialorder %v1692_v27, 0.0  ;;  %v1740_v63 = vmul.f32 0.1, %v1692_v27 }
 0x377   :  { %v1814_v58 = vmul.f32 %v1799_v24, %v1758_v0  ;;  %v1759_v2 = vsel %vm1711_vm1, %v1687_v26, %v1735_v3  ;;  %vm1717_vm3 = vcmp.ge.f32.partialorder %v1693_v30, 0.0  ;;  %v1741_v59 = vmul.f32 0.1, %v1693_v30  ;;  %v1601_v54 = vpop.f32.mrb[16].mxu1 }
 0x378   :  { %v1815_v5 = vmul.f32 %v1803_v25, %v1759_v2  ;;  %v1764_v28 = vsel %vm1716_vm2, %v1692_v27, %v1740_v63  ;;  %v1650_v31 = vmul.f32 %v2787_v51, %v1601_v54  ;;  %v1603_v33 = vpop.f32.mrb[17].mxu1 }
 0x379   :  { %v1820_v12 = vmul.f32 %v1799_v24, %v1764_v28  ;;  %v1765_v34 = vsel %vm1717_vm3, %v1693_v30, %v1741_v59  ;;  %v1651_v7 = vmul.f32 %v2787_v51, %v1603_v33  ;;  %v1605_v32 = vpop.f32.mrb[18].mxu1 }
 0x37a   :  { %v2030_v19 = vpack.c.bf16 %v1815_v5, %v1814_v58  ;;  %v1821_v61 = vmul.f32 %v1803_v25, %v1765_v34  ;;  %v1698_v36 = vadd.f32 %v2815_v9, %v1650_v31  ;;  %v1656_v37 = vmul.f32 %v2789_v55, %v1605_v32  ;;  %v1607_v38 = vpop.f32.mrb[19].mxu1 }
 0x37b   :  { %v1699_v16 = vadd.f32 %v2815_v9, %v1651_v7  ;;  %v1657_v45 = vmul.f32 %v2789_v55, %v1607_v38 }
 0x37c   :  { %1908 = vst [vmem:[#allocation7 + $0x10] sm:$0xff] %v2030_v19  ;;  %v2033_v62 = vpack.c.bf16 %v1821_v61, %v1820_v12  ;;  %vm1722_vm4 = vcmp.ge.f32.partialorder %v1698_v36, 0.0  ;;  %v1746_v39 = vmul.f32 0.1, %v1698_v36  ;;  %v1704_v8 = vadd.f32 %v2820_v40, %v1656_v37 }
 0x37d   :  { %vm1723_vm5 = vcmp.ge.f32.partialorder %v1699_v16, 0.0  ;;  %v1747_v51 = vmul.f32 0.1, %v1699_v16  ;;  %v1705_v4 = vadd.f32 %v2820_v40, %v1657_v45 }
 0x37e   :  { %1911 = vst [vmem:[#allocation7 + $0x2c] sm:$0xff] %v2033_v62  ;;  %v1770_v35 = vsel %vm1722_vm4, %v1698_v36, %v1746_v39  ;;  %vm1728_vm6 = vcmp.ge.f32.partialorder %v1704_v8, 0.0  ;;  %v1752_v15 = vmul.f32 0.1, %v1704_v8 }
 0x37f   :  { %v1826_v41 = vmul.f32 %v1799_v24, %v1770_v35  ;;  %v1771_v49 = vsel %vm1723_vm5, %v1699_v16, %v1747_v51  ;;  %vm1729_vm7 = vcmp.ge.f32.partialorder %v1705_v4, 0.0  ;;  %v1753_v9 = vmul.f32 0.1, %v1705_v4 }
 0x380   :  { %v1827_v17 = vmul.f32 %v1803_v25, %v1771_v49  ;;  %v1776_v55 = vsel %vm1728_vm6, %v1704_v8, %v1752_v15 }
 0x381   :  { %v1832_v23 = vmul.f32 %v1799_v24, %v1776_v55  ;;  %v1777_v43 = vsel %vm1729_vm7, %v1705_v4, %v1753_v9 }
 0x382   :  { %v2036_v46 = vpack.c.bf16 %v1827_v17, %v1826_v41  ;;  %v1833_v29 = vmul.f32 %v1803_v25, %v1777_v43 }
 0x384   :  { %1914 = vst [vmem:[#allocation7 + $0x48] sm:$0xff] %v2036_v46  ;;  %v2039_v14 = vpack.c.bf16 %v1833_v29, %v1832_v23 }
 0x386   :  { %1917 = vst [vmem:[#allocation7 + $0x64] sm:$0xff] %v2039_v14 }
 0x387   :  { %2116 = shalt.err (!%p2113_p12)
}
 0x388   :  { %s2117_s11 = scalar_lea.hbm %s2891_s9, 1792 }
 0x389   :  { %p2118_p13 = scmp.ne.s32.totalorder %s2891_s9, %s2117_s11  ;;  %p2121_p0 = scmp.lt.u32.totalorder %s2117_s11, %s2891_s9 }
 0x38b   :  { %p2123_p1 = pnand %p2121_p0, %p2118_p13 }
 0x38d   :  { %2126 = shalt.err (!%p2123_p1)
}
 0x38e   :  { %s2144_s1 = smov 448   ;;  %s2145_s15 = smov 28  }
 0x38f   :  { %1933 = dma.vmem_to_hbm [thread:$0]  %s1928_s30, 1792, %s2891_s9, [#allocation6], %s2144_s1, %s2144_s1, %s2145_s15  }
 0x390   :  { %2129 = dma.done.wait [#allocation6], 1792  }
 0x391   :  { %2130 = vsyncadd [#allocation6], 4294965504 }
 0x392   :  { %1937 = vsyncpa [#allocation5], 1 }
 0x393   :  { %1938 = vsyncpa [#allocation6], 1 }

</bundles_post_ra>
